<compile_context>
chip_gen: v5e
topology: v5e:2x2
jax: 0.10.0
libtpu: 0.0.40
codegen_flags: <defaults>
</compile_context>

<pallas_src>
import jax
import jax.numpy as jnp
from jax.experimental import pallas as pl
from jax.experimental.pallas import tpu as pltpu


def _round_up(v, m):
    return ((v + m - 1) // m) * m


def cls_head_kernel(w1_ref, b1_ref, w2d_ref, b2d_ref, xa_ref, xh_ref, out_ref,
                    xwin_ref, col_ref):
    # w1_ref : (C_out_p, K*C_in)   conv1 weights, contraction flattened (k*C_in + c)
    # b1_ref : (C_out_p, 1)
    # w2d_ref: (1, C_out_p)        w2[1] - w2[0]  (2-class softmax == sigmoid of diff)
    # b2d_ref: (1, 1)              b2[1] - b2[0]
    # xa_ref : (C_in, TILE_L)      main input block
    # xh_ref : (C_in, HALO)        halo block immediately after xa (HALO >= K-1)
    # out_ref: (2, TILE_L)
    # xwin_ref: (C_in, TILE_L+HALO) VMEM scratch (staged window)
    # col_ref : (K*C_in, TILE_L)    VMEM scratch (im2col matrix)
    C_in, TILE_L = xa_ref.shape
    HALO = xh_ref.shape[-1]
    KC = col_ref.shape[0]
    K_size = KC // C_in

    # Stage tile + halo once (both stores are lane-aligned).
    xwin_ref[:, :TILE_L] = xa_ref[...]
    xwin_ref[:, TILE_L:TILE_L + HALO] = xh_ref[...]

    # Build the im2col matrix: row block k holds x[:, k : k+TILE_L].
    # The K lane shifts happen once here, decoupled from the MXU pushes.
    # Static copy loop: each iteration's live range is one small slice, so the
    # unroll does not inflate vreg pressure.
    for k in range(K_size):
        col_ref[k * C_in:(k + 1) * C_in, :] = xwin_ref[:, k:k + TILE_L]

    # Conv1d(C_in, C_out, K) == ONE matmul with contraction depth K*C_in.
    h = jnp.dot(w1_ref[...], col_ref[...], preferred_element_type=jnp.float32)
    h = jnp.maximum(h + b1_ref[...], 0.0)                     # bias + ReLU (lane-dense)

    # Conv1d(C_out, 2, 1) + Softmax(dim=1) over 2 classes:
    #   p1 = sigmoid(d),  p0 = 1 - p1,  d = (w2[1]-w2[0]) @ h + (b2[1]-b2[0]).
    d = jnp.dot(w2d_ref[...], h, preferred_element_type=jnp.float32) + b2d_ref[...]
    p1 = pl.reciprocal(1.0 + jnp.exp(-d), approx=False)        # exact sigmoid
    p0 = 1.0 - p1
    out_ref[...] = jnp.concatenate([p0, p1], axis=0)            # (2, TILE_L)


def cls_head_forward(x, w1, b1, w2, b2, *, max_tile_l=2048,
                     compute_dtype=jnp.float32):
    """x: (N, C_in, L) float, NCL layout like PyTorch Conv1d.

    w1: (C_out, C_in, K=64), b1: (C_out,), w2: (2, C_out, 1), b2: (2,)
    returns: (N, 2, L_out) with L_out = L - K + 1, softmax over channel dim (=1).

    compute_dtype=jnp.bfloat16 halves input HBM bytes (recommended on v5e);
    MXU accumulation and all elementwise math stay float32.
    """
    N, C_in, L = x.shape
    C_out, C_in_w, K_size = w1.shape
    assert C_in_w == C_in and w2.shape == (2, C_out, 1) and b2.shape == (2,)
    L_out = L - K_size + 1
    assert L_out >= 1

    # Halo: one lane-aligned block >= K-1 samples (128 for this module's K=64).
    HALO = _round_up(max(K_size - 1, 1), 128)
    # L tile: multiple of HALO; large tiles amortize per-step overhead.  Keep
    # max_tile_l moderate so N*num_tiles stays >= 2 for v7x megacore balance.
    TILE_L = max(HALO, min(_round_up(max_tile_l, HALO), _round_up(L_out, HALO)))
    num_tiles = -(-L_out // TILE_L)
    L_pad = num_tiles * TILE_L + HALO          # only a small tail pad of x

    C_out_p = _round_up(C_out, 8)
    KC = K_size * C_in

    # Tail-pad the length only; no channel padding, no full zeros+scatter copy.
    x_p = jnp.pad(x.astype(compute_dtype), ((0, 0), (0, 0), (0, L_pad - L)))

    # Conv1 weights flattened so column index = k*C_in + c (matches im2col rows).
    w1_flat = jnp.transpose(w1.astype(jnp.float32), (0, 2, 1)).reshape(C_out, KC)
    w1_flat = jnp.pad(w1_flat, ((0, C_out_p - C_out), (0, 0))).astype(compute_dtype)
    b1_m = jnp.pad(b1.astype(jnp.float32), (0, C_out_p - C_out)).reshape(C_out_p, 1)
    w2_flat = w2.astype(jnp.float32).reshape(2, C_out)
    w2_diff = jnp.pad((w2_flat[1] - w2_flat[0])[None, :],
                      ((0, 0), (0, C_out_p - C_out)))
    b2f = b2.astype(jnp.float32)
    b2_diff = (b2f[1] - b2f[0]).reshape(1, 1)

    itemsize = jnp.dtype(compute_dtype).itemsize
    flops = 2 * N * L_out * (C_out * KC + C_out)
    bytes_accessed = (N * num_tiles * C_in * (TILE_L + HALO) * itemsize
                      + N * num_tiles * 2 * TILE_L * 4
                      + 4 * (w1_flat.size + b1_m.size + w2_diff.size + b2_diff.size))

    halo_blocks = TILE_L // HALO   # halo block index stride (element offset (j+1)*TILE_L)

    out = pl.pallas_call(
        cls_head_kernel,
        out_shape=jax.ShapeDtypeStruct((N, 2, num_tiles * TILE_L), jnp.float32),
        grid=(N, num_tiles),
        in_specs=[
            pl.BlockSpec((C_out_p, KC), lambda n, j: (0, 0)),
            pl.BlockSpec((C_out_p, 1), lambda n, j: (0, 0)),
            pl.BlockSpec((1, C_out_p), lambda n, j: (0, 0)),
            pl.BlockSpec((1, 1), lambda n, j: (0, 0)),
            pl.BlockSpec((None, C_in, TILE_L), lambda n, j: (n, 0, j)),
            pl.BlockSpec((None, C_in, HALO),
                         lambda n, j: (n, 0, (j + 1) * halo_blocks)),
        ],
        out_specs=pl.BlockSpec((None, 2, TILE_L), lambda n, j: (n, 0, j)),
        scratch_shapes=[
            pltpu.VMEM((C_in, TILE_L + HALO), compute_dtype),   # staged window
            pltpu.VMEM((KC, TILE_L), compute_dtype),            # im2col matrix
        ],
        compiler_params=pltpu.CompilerParams(
            dimension_semantics=("parallel", "parallel"),
            vmem_limit_bytes=32 * 1024 * 1024),
        cost_estimate=pl.CostEstimate(
            flops=flops, transcendentals=N * L_out, bytes_accessed=bytes_accessed),
    )(w1_flat, b1_m, w2_diff, b2_diff, x_p, x_p)

    # Drop the padded tail; output is already channel-major (N, 2, L_out).
    return out[:, :, :L_out]


def _reference(x, w1, b1, w2, b2):
    """Pure-JAX reference matching the PyTorch module."""
    N, C_in, L = x.shape
    C_out, _, K_size = w1.shape
    L_out = L - K_size + 1
    idx = jnp.arange(L_out)[:, None] + jnp.arange(K_size)[None, :]
    patches = x[:, :, idx]                                        # (N, C_in, L_out, K)
    h = jnp.einsum('nclk,ock->nol', patches, w1,
                   precision=jax.lax.Precision.HIGHEST) + b1[None, :, None]
    h = jnp.maximum(h, 0.0)
    z = jnp.einsum('nol,po->npl', h, w2[:, :, 0],
                   precision=jax.lax.Precision.HIGHEST) + b2[None, :, None]
    return jax.nn.softmax(z, axis=1)


if __name__ == "__main__":
    key = jax.random.PRNGKey(0)
    k_x, k_w1, k_b1, k_w2, k_b2 = jax.random.split(key, 5)

    # Small shapes consistent with the module: Conv1d kernel size is 64, so L >= 64.
    N, C_in, C_out, L = 2, 4, 8, 80        # -> L_out = 17
    K_size = 64

    x = jax.random.normal(k_x, (N, C_in, L), dtype=jnp.float32)
    w1 = 0.05 * jax.random.normal(k_w1, (C_out, C_in, K_size), dtype=jnp.float32)
    b1 = 0.05 * jax.random.normal(k_b1, (C_out,), dtype=jnp.float32)
    w2 = 0.05 * jax.random.normal(k_w2, (2, C_out, 1), dtype=jnp.float32)
    b2 = 0.05 * jax.random.normal(k_b2, (2,), dtype=jnp.float32)

    y = cls_head_forward(x, w1, b1, w2, b2)
    jax.block_until_ready(y)

    assert y.shape == (N, 2, L - K_size + 1)
    # Softmax over dim=1 must sum to 1.
    assert bool(jnp.allclose(jnp.sum(y, axis=1), 1.0, atol=1e-5))
    # Match the pure-JAX reference (loose tol: reassociated conv / matmul passes).
    y_ref = _reference(x, w1, b1, w2, b2)
    assert bool(jnp.allclose(y, y_ref, atol=5e-3)), float(jnp.max(jnp.abs(y - y_ref)))

    print("KERNEL_OK")
</pallas_src>

<mosaic_0001>
module attributes {stable_mosaic.version = 11 : i64} {
  func.func @cls_head_kernel(%arg0: i32, %arg1: i32, %arg2: memref<8x256xf32, #tpu.memory_space<vmem>>, %arg3: memref<8x1xf32, #tpu.memory_space<vmem>>, %arg4: memref<1x8xf32, #tpu.memory_space<vmem>>, %arg5: memref<1x1xf32, #tpu.memory_space<vmem>>, %arg6: memref<1x4x128xf32, #tpu.memory_space<vmem>>, %arg7: memref<1x4x128xf32, #tpu.memory_space<vmem>>, %arg8: memref<1x2x128xf32, #tpu.memory_space<vmem>>, %arg9: memref<4x256xf32, #tpu.memory_space<vmem>>, %arg10: memref<256x128xf32, #tpu.memory_space<vmem>>) attributes {dimension_semantics = [#tpu.dimension_semantics<parallel>, #tpu.dimension_semantics<parallel>], iteration_bounds = array<i64: 2, 1>, scalar_prefetch = 0 : i64, scratch_operands = 2 : i64, tpu.core_type = #tpu.core_type<tc>, window_params = [{pipeline_mode = #tpu.pipeline_mode<synchronous>, transform_indices = @transform_0, window_bounds = array<i64: 8, 256>}, {pipeline_mode = #tpu.pipeline_mode<synchronous>, transform_indices = @transform_1, window_bounds = array<i64: 8, 1>}, {pipeline_mode = #tpu.pipeline_mode<synchronous>, transform_indices = @transform_2, window_bounds = array<i64: 1, 8>}, {pipeline_mode = #tpu.pipeline_mode<synchronous>, transform_indices = @transform_3, window_bounds = array<i64: 1, 1>}, {transform_indices = @transform_4, window_bounds = array<i64: 1, 4, 128>}, {transform_indices = @transform_5, window_bounds = array<i64: 1, 4, 128>}, {transform_indices = @transform_6, window_bounds = array<i64: 1, 2, 128>}]} {
    %c0 = arith.constant 0 : index
    %c0_0 = arith.constant 0 : index
    %c0_1 = arith.constant 0 : index
    %0 = vector.load %arg6[%c0, %c0_0, %c0_1] : memref<1x4x128xf32, #tpu.memory_space<vmem>>, vector<1x4x128xf32>
    %1 = vector.shape_cast %0 : vector<1x4x128xf32> to vector<4x128xf32>
    %c0_2 = arith.constant 0 : index
    %c0_3 = arith.constant 0 : index
    %2 = vector.load %arg9[%c0_2, %c0_3] : memref<4x256xf32, #tpu.memory_space<vmem>>, vector<4x128xf32>
    tpu.vector_store %arg9[%c0_2, %c0_3], %1 {strides = array<i32>} : memref<4x256xf32, #tpu.memory_space<vmem>>, vector<4x128xf32>,
    %c0_4 = arith.constant 0 : index
    %c0_5 = arith.constant 0 : index
    %c0_6 = arith.constant 0 : index
    %3 = vector.load %arg7[%c0_4, %c0_5, %c0_6] : memref<1x4x128xf32, #tpu.memory_space<vmem>>, vector<1x4x128xf32>
    %4 = vector.shape_cast %3 : vector<1x4x128xf32> to vector<4x128xf32>
    %c0_7 = arith.constant 0 : index
    %c128 = arith.constant 128 : index
    %5 = vector.load %arg9[%c0_7, %c128] : memref<4x256xf32, #tpu.memory_space<vmem>>, vector<4x128xf32>
    tpu.vector_store %arg9[%c0_7, %c128], %4 {strides = array<i32>} : memref<4x256xf32, #tpu.memory_space<vmem>>, vector<4x128xf32>,
    %c0_8 = arith.constant 0 : index
    %c0_9 = arith.constant 0 : index
    %6 = vector.load %arg9[%c0_8, %c0_9] : memref<4x256xf32, #tpu.memory_space<vmem>>, vector<4x128xf32>
    %c0_10 = arith.constant 0 : index
    %c0_11 = arith.constant 0 : index
    %7 = vector.load %arg10[%c0_10, %c0_11] : memref<256x128xf32, #tpu.memory_space<vmem>>, vector<4x128xf32>
    tpu.vector_store %arg10[%c0_10, %c0_11], %6 {strides = array<i32>} : memref<256x128xf32, #tpu.memory_space<vmem>>, vector<4x128xf32>,
    %c0_12 = arith.constant 0 : index
    %c1 = arith.constant 1 : index
    %8 = vector.load %arg9[%c0_12, %c1] : memref<4x256xf32, #tpu.memory_space<vmem>>, vector<4x128xf32>
    %c4 = arith.constant 4 : index
    %c0_13 = arith.constant 0 : index
    %9 = vector.load %arg10[%c4, %c0_13] : memref<256x128xf32, #tpu.memory_space<vmem>>, vector<4x128xf32>
    tpu.vector_store %arg10[%c4, %c0_13], %8 {strides = array<i32>} : memref<256x128xf32, #tpu.memory_space<vmem>>, vector<4x128xf32>,
    %c0_14 = arith.constant 0 : index
    %c2 = arith.constant 2 : index
    %10 = vector.load %arg9[%c0_14, %c2] : memref<4x256xf32, #tpu.memory_space<vmem>>, vector<4x128xf32>
    %c8 = arith.constant 8 : index
    %c0_15 = arith.constant 0 : index
    %11 = vector.load %arg10[%c8, %c0_15] : memref<256x128xf32, #tpu.memory_space<vmem>>, vector<4x128xf32>
    tpu.vector_store %arg10[%c8, %c0_15], %10 {strides = array<i32>} : memref<256x128xf32, #tpu.memory_space<vmem>>, vector<4x128xf32>,
    %c0_16 = arith.constant 0 : index
    %c3 = arith.constant 3 : index
    %12 = vector.load %arg9[%c0_16, %c3] : memref<4x256xf32, #tpu.memory_space<vmem>>, vector<4x128xf32>
    %c12 = arith.constant 12 : index
    %c0_17 = arith.constant 0 : index
    %13 = vector.load %arg10[%c12, %c0_17] : memref<256x128xf32, #tpu.memory_space<vmem>>, vector<4x128xf32>
    tpu.vector_store %arg10[%c12, %c0_17], %12 {strides = array<i32>} : memref<256x128xf32, #tpu.memory_space<vmem>>, vector<4x128xf32>,
    %c0_18 = arith.constant 0 : index
    %c4_19 = arith.constant 4 : index
    %14 = vector.load %arg9[%c0_18, %c4_19] : memref<4x256xf32, #tpu.memory_space<vmem>>, vector<4x128xf32>
    %c16 = arith.constant 16 : index
    %c0_20 = arith.constant 0 : index
    %15 = vector.load %arg10[%c16, %c0_20] : memref<256x128xf32, #tpu.memory_space<vmem>>, vector<4x128xf32>
    tpu.vector_store %arg10[%c16, %c0_20], %14 {strides = array<i32>} : memref<256x128xf32, #tpu.memory_space<vmem>>, vector<4x128xf32>,
    %c0_21 = arith.constant 0 : index
    %c5 = arith.constant 5 : index
    %16 = vector.load %arg9[%c0_21, %c5] : memref<4x256xf32, #tpu.memory_space<vmem>>, vector<4x128xf32>
    %c20 = arith.constant 20 : index
    %c0_22 = arith.constant 0 : index
    %17 = vector.load %arg10[%c20, %c0_22] : memref<256x128xf32, #tpu.memory_space<vmem>>, vector<4x128xf32>
    tpu.vector_store %arg10[%c20, %c0_22], %16 {strides = array<i32>} : memref<256x128xf32, #tpu.memory_space<vmem>>, vector<4x128xf32>,
    %c0_23 = arith.constant 0 : index
    %c6 = arith.constant 6 : index
    %18 = vector.load %arg9[%c0_23, %c6] : memref<4x256xf32, #tpu.memory_space<vmem>>, vector<4x128xf32>
    %c24 = arith.constant 24 : index
    %c0_24 = arith.constant 0 : index
    %19 = vector.load %arg10[%c24, %c0_24] : memref<256x128xf32, #tpu.memory_space<vmem>>, vector<4x128xf32>
    tpu.vector_store %arg10[%c24, %c0_24], %18 {strides = array<i32>} : memref<256x128xf32, #tpu.memory_space<vmem>>, vector<4x128xf32>,
    %c0_25 = arith.constant 0 : index
    %c7 = arith.constant 7 : index
    %20 = vector.load %arg9[%c0_25, %c7] : memref<4x256xf32, #tpu.memory_space<vmem>>, vector<4x128xf32>
    %c28 = arith.constant 28 : index
    %c0_26 = arith.constant 0 : index
    %21 = vector.load %arg10[%c28, %c0_26] : memref<256x128xf32, #tpu.memory_space<vmem>>, vector<4x128xf32>
    tpu.vector_store %arg10[%c28, %c0_26], %20 {strides = array<i32>} : memref<256x128xf32, #tpu.memory_space<vmem>>, vector<4x128xf32>,
    %c0_27 = arith.constant 0 : index
    %c8_28 = arith.constant 8 : index
    %22 = vector.load %arg9[%c0_27, %c8_28] : memref<4x256xf32, #tpu.memory_space<vmem>>, vector<4x128xf32>
    %c32 = arith.constant 32 : index
    %c0_29 = arith.constant 0 : index
    %23 = vector.load %arg10[%c32, %c0_29] : memref<256x128xf32, #tpu.memory_space<vmem>>, vector<4x128xf32>
    tpu.vector_store %arg10[%c32, %c0_29], %22 {strides = array<i32>} : memref<256x128xf32, #tpu.memory_space<vmem>>, vector<4x128xf32>,
    %c0_30 = arith.constant 0 : index
    %c9 = arith.constant 9 : index
    %24 = vector.load %arg9[%c0_30, %c9] : memref<4x256xf32, #tpu.memory_space<vmem>>, vector<4x128xf32>
    %c36 = arith.constant 36 : index
    %c0_31 = arith.constant 0 : index
    %25 = vector.load %arg10[%c36, %c0_31] : memref<256x128xf32, #tpu.memory_space<vmem>>, vector<4x128xf32>
    tpu.vector_store %arg10[%c36, %c0_31], %24 {strides = array<i32>} : memref<256x128xf32, #tpu.memory_space<vmem>>, vector<4x128xf32>,
    %c0_32 = arith.constant 0 : index
    %c10 = arith.constant 10 : index
    %26 = vector.load %arg9[%c0_32, %c10] : memref<4x256xf32, #tpu.memory_space<vmem>>, vector<4x128xf32>
    %c40 = arith.constant 40 : index
    %c0_33 = arith.constant 0 : index
    %27 = vector.load %arg10[%c40, %c0_33] : memref<256x128xf32, #tpu.memory_space<vmem>>, vector<4x128xf32>
    tpu.vector_store %arg10[%c40, %c0_33], %26 {strides = array<i32>} : memref<256x128xf32, #tpu.memory_space<vmem>>, vector<4x128xf32>,
    %c0_34 = arith.constant 0 : index
    %c11 = arith.constant 11 : index
    %28 = vector.load %arg9[%c0_34, %c11] : memref<4x256xf32, #tpu.memory_space<vmem>>, vector<4x128xf32>
    %c44 = arith.constant 44 : index
    %c0_35 = arith.constant 0 : index
    %29 = vector.load %arg10[%c44, %c0_35] : memref<256x128xf32, #tpu.memory_space<vmem>>, vector<4x128xf32>
    tpu.vector_store %arg10[%c44, %c0_35], %28 {strides = array<i32>} : memref<256x128xf32, #tpu.memory_space<vmem>>, vector<4x128xf32>,
    %c0_36 = arith.constant 0 : index
    %c12_37 = arith.constant 12 : index
    %30 = vector.load %arg9[%c0_36, %c12_37] : memref<4x256xf32, #tpu.memory_space<vmem>>, vector<4x128xf32>
    %c48 = arith.constant 48 : index
    %c0_38 = arith.constant 0 : index
    %31 = vector.load %arg10[%c48, %c0_38] : memref<256x128xf32, #tpu.memory_space<vmem>>, vector<4x128xf32>
    tpu.vector_store %arg10[%c48, %c0_38], %30 {strides = array<i32>} : memref<256x128xf32, #tpu.memory_space<vmem>>, vector<4x128xf32>,
    %c0_39 = arith.constant 0 : index
    %c13 = arith.constant 13 : index
    %32 = vector.load %arg9[%c0_39, %c13] : memref<4x256xf32, #tpu.memory_space<vmem>>, vector<4x128xf32>
    %c52 = arith.constant 52 : index
    %c0_40 = arith.constant 0 : index
    %33 = vector.load %arg10[%c52, %c0_40] : memref<256x128xf32, #tpu.memory_space<vmem>>, vector<4x128xf32>
    tpu.vector_store %arg10[%c52, %c0_40], %32 {strides = array<i32>} : memref<256x128xf32, #tpu.memory_space<vmem>>, vector<4x128xf32>,
    %c0_41 = arith.constant 0 : index
    %c14 = arith.constant 14 : index
    %34 = vector.load %arg9[%c0_41, %c14] : memref<4x256xf32, #tpu.memory_space<vmem>>, vector<4x128xf32>
    %c56 = arith.constant 56 : index
    %c0_42 = arith.constant 0 : index
    %35 = vector.load %arg10[%c56, %c0_42] : memref<256x128xf32, #tpu.memory_space<vmem>>, vector<4x128xf32>
    tpu.vector_store %arg10[%c56, %c0_42], %34 {strides = array<i32>} : memref<256x128xf32, #tpu.memory_space<vmem>>, vector<4x128xf32>,
    %c0_43 = arith.constant 0 : index
    %c15 = arith.constant 15 : index
    %36 = vector.load %arg9[%c0_43, %c15] : memref<4x256xf32, #tpu.memory_space<vmem>>, vector<4x128xf32>
    %c60 = arith.constant 60 : index
    %c0_44 = arith.constant 0 : index
    %37 = vector.load %arg10[%c60, %c0_44] : memref<256x128xf32, #tpu.memory_space<vmem>>, vector<4x128xf32>
    tpu.vector_store %arg10[%c60, %c0_44], %36 {strides = array<i32>} : memref<256x128xf32, #tpu.memory_space<vmem>>, vector<4x128xf32>,
    %c0_45 = arith.constant 0 : index
    %c16_46 = arith.constant 16 : index
    %38 = vector.load %arg9[%c0_45, %c16_46] : memref<4x256xf32, #tpu.memory_space<vmem>>, vector<4x128xf32>
    %c64 = arith.constant 64 : index
    %c0_47 = arith.constant 0 : index
    %39 = vector.load %arg10[%c64, %c0_47] : memref<256x128xf32, #tpu.memory_space<vmem>>, vector<4x128xf32>
    tpu.vector_store %arg10[%c64, %c0_47], %38 {strides = array<i32>} : memref<256x128xf32, #tpu.memory_space<vmem>>, vector<4x128xf32>,
    %c0_48 = arith.constant 0 : index
    %c17 = arith.constant 17 : index
    %40 = vector.load %arg9[%c0_48, %c17] : memref<4x256xf32, #tpu.memory_space<vmem>>, vector<4x128xf32>
    %c68 = arith.constant 68 : index
    %c0_49 = arith.constant 0 : index
    %41 = vector.load %arg10[%c68, %c0_49] : memref<256x128xf32, #tpu.memory_space<vmem>>, vector<4x128xf32>
    tpu.vector_store %arg10[%c68, %c0_49], %40 {strides = array<i32>} : memref<256x128xf32, #tpu.memory_space<vmem>>, vector<4x128xf32>,
    %c0_50 = arith.constant 0 : index
    %c18 = arith.constant 18 : index
    %42 = vector.load %arg9[%c0_50, %c18] : memref<4x256xf32, #tpu.memory_space<vmem>>, vector<4x128xf32>
    %c72 = arith.constant 72 : index
    %c0_51 = arith.constant 0 : index
    %43 = vector.load %arg10[%c72, %c0_51] : memref<256x128xf32, #tpu.memory_space<vmem>>, vector<4x128xf32>
    tpu.vector_store %arg10[%c72, %c0_51], %42 {strides = array<i32>} : memref<256x128xf32, #tpu.memory_space<vmem>>, vector<4x128xf32>,
    %c0_52 = arith.constant 0 : index
    %c19 = arith.constant 19 : index
    %44 = vector.load %arg9[%c0_52, %c19] : memref<4x256xf32, #tpu.memory_space<vmem>>, vector<4x128xf32>
    %c76 = arith.constant 76 : index
    %c0_53 = arith.constant 0 : index
    %45 = vector.load %arg10[%c76, %c0_53] : memref<256x128xf32, #tpu.memory_space<vmem>>, vector<4x128xf32>
    tpu.vector_store %arg10[%c76, %c0_53], %44 {strides = array<i32>} : memref<256x128xf32, #tpu.memory_space<vmem>>, vector<4x128xf32>,
    %c0_54 = arith.constant 0 : index
    %c20_55 = arith.constant 20 : index
    %46 = vector.load %arg9[%c0_54, %c20_55] : memref<4x256xf32, #tpu.memory_space<vmem>>, vector<4x128xf32>
    %c80 = arith.constant 80 : index
    %c0_56 = arith.constant 0 : index
    %47 = vector.load %arg10[%c80, %c0_56] : memref<256x128xf32, #tpu.memory_space<vmem>>, vector<4x128xf32>
    tpu.vector_store %arg10[%c80, %c0_56], %46 {strides = array<i32>} : memref<256x128xf32, #tpu.memory_space<vmem>>, vector<4x128xf32>,
    %c0_57 = arith.constant 0 : index
    %c21 = arith.constant 21 : index
    %48 = vector.load %arg9[%c0_57, %c21] : memref<4x256xf32, #tpu.memory_space<vmem>>, vector<4x128xf32>
    %c84 = arith.constant 84 : index
    %c0_58 = arith.constant 0 : index
    %49 = vector.load %arg10[%c84, %c0_58] : memref<256x128xf32, #tpu.memory_space<vmem>>, vector<4x128xf32>
    tpu.vector_store %arg10[%c84, %c0_58], %48 {strides = array<i32>} : memref<256x128xf32, #tpu.memory_space<vmem>>, vector<4x128xf32>,
    %c0_59 = arith.constant 0 : index
    %c22 = arith.constant 22 : index
    %50 = vector.load %arg9[%c0_59, %c22] : memref<4x256xf32, #tpu.memory_space<vmem>>, vector<4x128xf32>
    %c88 = arith.constant 88 : index
    %c0_60 = arith.constant 0 : index
    %51 = vector.load %arg10[%c88, %c0_60] : memref<256x128xf32, #tpu.memory_space<vmem>>, vector<4x128xf32>
    tpu.vector_store %arg10[%c88, %c0_60], %50 {strides = array<i32>} : memref<256x128xf32, #tpu.memory_space<vmem>>, vector<4x128xf32>,
    %c0_61 = arith.constant 0 : index
    %c23 = arith.constant 23 : index
    %52 = vector.load %arg9[%c0_61, %c23] : memref<4x256xf32, #tpu.memory_space<vmem>>, vector<4x128xf32>
    %c92 = arith.constant 92 : index
    %c0_62 = arith.constant 0 : index
    %53 = vector.load %arg10[%c92, %c0_62] : memref<256x128xf32, #tpu.memory_space<vmem>>, vector<4x128xf32>
    tpu.vector_store %arg10[%c92, %c0_62], %52 {strides = array<i32>} : memref<256x128xf32, #tpu.memory_space<vmem>>, vector<4x128xf32>,
    %c0_63 = arith.constant 0 : index
    %c24_64 = arith.constant 24 : index
    %54 = vector.load %arg9[%c0_63, %c24_64] : memref<4x256xf32, #tpu.memory_space<vmem>>, vector<4x128xf32>
    %c96 = arith.constant 96 : index
    %c0_65 = arith.constant 0 : index
    %55 = vector.load %arg10[%c96, %c0_65] : memref<256x128xf32, #tpu.memory_space<vmem>>, vector<4x128xf32>
    tpu.vector_store %arg10[%c96, %c0_65], %54 {strides = array<i32>} : memref<256x128xf32, #tpu.memory_space<vmem>>, vector<4x128xf32>,
    %c0_66 = arith.constant 0 : index
    %c25 = arith.constant 25 : index
    %56 = vector.load %arg9[%c0_66, %c25] : memref<4x256xf32, #tpu.memory_space<vmem>>, vector<4x128xf32>
    %c100 = arith.constant 100 : index
    %c0_67 = arith.constant 0 : index
    %57 = vector.load %arg10[%c100, %c0_67] : memref<256x128xf32, #tpu.memory_space<vmem>>, vector<4x128xf32>
    tpu.vector_store %arg10[%c100, %c0_67], %56 {strides = array<i32>} : memref<256x128xf32, #tpu.memory_space<vmem>>, vector<4x128xf32>,
    %c0_68 = arith.constant 0 : index
    %c26 = arith.constant 26 : index
    %58 = vector.load %arg9[%c0_68, %c26] : memref<4x256xf32, #tpu.memory_space<vmem>>, vector<4x128xf32>
    %c104 = arith.constant 104 : index
    %c0_69 = arith.constant 0 : index
    %59 = vector.load %arg10[%c104, %c0_69] : memref<256x128xf32, #tpu.memory_space<vmem>>, vector<4x128xf32>
    tpu.vector_store %arg10[%c104, %c0_69], %58 {strides = array<i32>} : memref<256x128xf32, #tpu.memory_space<vmem>>, vector<4x128xf32>,
    %c0_70 = arith.constant 0 : index
    %c27 = arith.constant 27 : index
    %60 = vector.load %arg9[%c0_70, %c27] : memref<4x256xf32, #tpu.memory_space<vmem>>, vector<4x128xf32>
    %c108 = arith.constant 108 : index
    %c0_71 = arith.constant 0 : index
    %61 = vector.load %arg10[%c108, %c0_71] : memref<256x128xf32, #tpu.memory_space<vmem>>, vector<4x128xf32>
    tpu.vector_store %arg10[%c108, %c0_71], %60 {strides = array<i32>} : memref<256x128xf32, #tpu.memory_space<vmem>>, vector<4x128xf32>,
    %c0_72 = arith.constant 0 : index
    %c28_73 = arith.constant 28 : index
    %62 = vector.load %arg9[%c0_72, %c28_73] : memref<4x256xf32, #tpu.memory_space<vmem>>, vector<4x128xf32>
    %c112 = arith.constant 112 : index
    %c0_74 = arith.constant 0 : index
    %63 = vector.load %arg10[%c112, %c0_74] : memref<256x128xf32, #tpu.memory_space<vmem>>, vector<4x128xf32>
    tpu.vector_store %arg10[%c112, %c0_74], %62 {strides = array<i32>} : memref<256x128xf32, #tpu.memory_space<vmem>>, vector<4x128xf32>,
    %c0_75 = arith.constant 0 : index
    %c29 = arith.constant 29 : index
    %64 = vector.load %arg9[%c0_75, %c29] : memref<4x256xf32, #tpu.memory_space<vmem>>, vector<4x128xf32>
    %c116 = arith.constant 116 : index
    %c0_76 = arith.constant 0 : index
    %65 = vector.load %arg10[%c116, %c0_76] : memref<256x128xf32, #tpu.memory_space<vmem>>, vector<4x128xf32>
    tpu.vector_store %arg10[%c116, %c0_76], %64 {strides = array<i32>} : memref<256x128xf32, #tpu.memory_space<vmem>>, vector<4x128xf32>,
    %c0_77 = arith.constant 0 : index
    %c30 = arith.constant 30 : index
    %66 = vector.load %arg9[%c0_77, %c30] : memref<4x256xf32, #tpu.memory_space<vmem>>, vector<4x128xf32>
    %c120 = arith.constant 120 : index
    %c0_78 = arith.constant 0 : index
    %67 = vector.load %arg10[%c120, %c0_78] : memref<256x128xf32, #tpu.memory_space<vmem>>, vector<4x128xf32>
    tpu.vector_store %arg10[%c120, %c0_78], %66 {strides = array<i32>} : memref<256x128xf32, #tpu.memory_space<vmem>>, vector<4x128xf32>,
    %c0_79 = arith.constant 0 : index
    %c31 = arith.constant 31 : index
    %68 = vector.load %arg9[%c0_79, %c31] : memref<4x256xf32, #tpu.memory_space<vmem>>, vector<4x128xf32>
    %c124 = arith.constant 124 : index
    %c0_80 = arith.constant 0 : index
    %69 = vector.load %arg10[%c124, %c0_80] : memref<256x128xf32, #tpu.memory_space<vmem>>, vector<4x128xf32>
    tpu.vector_store %arg10[%c124, %c0_80], %68 {strides = array<i32>} : memref<256x128xf32, #tpu.memory_space<vmem>>, vector<4x128xf32>,
    %c0_81 = arith.constant 0 : index
    %c32_82 = arith.constant 32 : index
    %70 = vector.load %arg9[%c0_81, %c32_82] : memref<4x256xf32, #tpu.memory_space<vmem>>, vector<4x128xf32>
    %c128_83 = arith.constant 128 : index
    %c0_84 = arith.constant 0 : index
    %71 = vector.load %arg10[%c128_83, %c0_84] : memref<256x128xf32, #tpu.memory_space<vmem>>, vector<4x128xf32>
    tpu.vector_store %arg10[%c128_83, %c0_84], %70 {strides = array<i32>} : memref<256x128xf32, #tpu.memory_space<vmem>>, vector<4x128xf32>,
    %c0_85 = arith.constant 0 : index
    %c33 = arith.constant 33 : index
    %72 = vector.load %arg9[%c0_85, %c33] : memref<4x256xf32, #tpu.memory_space<vmem>>, vector<4x128xf32>
    %c132 = arith.constant 132 : index
    %c0_86 = arith.constant 0 : index
    %73 = vector.load %arg10[%c132, %c0_86] : memref<256x128xf32, #tpu.memory_space<vmem>>, vector<4x128xf32>
    tpu.vector_store %arg10[%c132, %c0_86], %72 {strides = array<i32>} : memref<256x128xf32, #tpu.memory_space<vmem>>, vector<4x128xf32>,
    %c0_87 = arith.constant 0 : index
    %c34 = arith.constant 34 : index
    %74 = vector.load %arg9[%c0_87, %c34] : memref<4x256xf32, #tpu.memory_space<vmem>>, vector<4x128xf32>
    %c136 = arith.constant 136 : index
    %c0_88 = arith.constant 0 : index
    %75 = vector.load %arg10[%c136, %c0_88] : memref<256x128xf32, #tpu.memory_space<vmem>>, vector<4x128xf32>
    tpu.vector_store %arg10[%c136, %c0_88], %74 {strides = array<i32>} : memref<256x128xf32, #tpu.memory_space<vmem>>, vector<4x128xf32>,
    %c0_89 = arith.constant 0 : index
    %c35 = arith.constant 35 : index
    %76 = vector.load %arg9[%c0_89, %c35] : memref<4x256xf32, #tpu.memory_space<vmem>>, vector<4x128xf32>
    %c140 = arith.constant 140 : index
    %c0_90 = arith.constant 0 : index
    %77 = vector.load %arg10[%c140, %c0_90] : memref<256x128xf32, #tpu.memory_space<vmem>>, vector<4x128xf32>
    tpu.vector_store %arg10[%c140, %c0_90], %76 {strides = array<i32>} : memref<256x128xf32, #tpu.memory_space<vmem>>, vector<4x128xf32>,
    %c0_91 = arith.constant 0 : index
    %c36_92 = arith.constant 36 : index
    %78 = vector.load %arg9[%c0_91, %c36_92] : memref<4x256xf32, #tpu.memory_space<vmem>>, vector<4x128xf32>
    %c144 = arith.constant 144 : index
    %c0_93 = arith.constant 0 : index
    %79 = vector.load %arg10[%c144, %c0_93] : memref<256x128xf32, #tpu.memory_space<vmem>>, vector<4x128xf32>
    tpu.vector_store %arg10[%c144, %c0_93], %78 {strides = array<i32>} : memref<256x128xf32, #tpu.memory_space<vmem>>, vector<4x128xf32>,
    %c0_94 = arith.constant 0 : index
    %c37 = arith.constant 37 : index
    %80 = vector.load %arg9[%c0_94, %c37] : memref<4x256xf32, #tpu.memory_space<vmem>>, vector<4x128xf32>
    %c148 = arith.constant 148 : index
    %c0_95 = arith.constant 0 : index
    %81 = vector.load %arg10[%c148, %c0_95] : memref<256x128xf32, #tpu.memory_space<vmem>>, vector<4x128xf32>
    tpu.vector_store %arg10[%c148, %c0_95], %80 {strides = array<i32>} : memref<256x128xf32, #tpu.memory_space<vmem>>, vector<4x128xf32>,
    %c0_96 = arith.constant 0 : index
    %c38 = arith.constant 38 : index
    %82 = vector.load %arg9[%c0_96, %c38] : memref<4x256xf32, #tpu.memory_space<vmem>>, vector<4x128xf32>
    %c152 = arith.constant 152 : index
    %c0_97 = arith.constant 0 : index
    %83 = vector.load %arg10[%c152, %c0_97] : memref<256x128xf32, #tpu.memory_space<vmem>>, vector<4x128xf32>
    tpu.vector_store %arg10[%c152, %c0_97], %82 {strides = array<i32>} : memref<256x128xf32, #tpu.memory_space<vmem>>, vector<4x128xf32>,
    %c0_98 = arith.constant 0 : index
    %c39 = arith.constant 39 : index
    %84 = vector.load %arg9[%c0_98, %c39] : memref<4x256xf32, #tpu.memory_space<vmem>>, vector<4x128xf32>
    %c156 = arith.constant 156 : index
    %c0_99 = arith.constant 0 : index
    %85 = vector.load %arg10[%c156, %c0_99] : memref<256x128xf32, #tpu.memory_space<vmem>>, vector<4x128xf32>
    tpu.vector_store %arg10[%c156, %c0_99], %84 {strides = array<i32>} : memref<256x128xf32, #tpu.memory_space<vmem>>, vector<4x128xf32>,
    %c0_100 = arith.constant 0 : index
    %c40_101 = arith.constant 40 : index
    %86 = vector.load %arg9[%c0_100, %c40_101] : memref<4x256xf32, #tpu.memory_space<vmem>>, vector<4x128xf32>
    %c160 = arith.constant 160 : index
    %c0_102 = arith.constant 0 : index
    %87 = vector.load %arg10[%c160, %c0_102] : memref<256x128xf32, #tpu.memory_space<vmem>>, vector<4x128xf32>
    tpu.vector_store %arg10[%c160, %c0_102], %86 {strides = array<i32>} : memref<256x128xf32, #tpu.memory_space<vmem>>, vector<4x128xf32>,
    %c0_103 = arith.constant 0 : index
    %c41 = arith.constant 41 : index
    %88 = vector.load %arg9[%c0_103, %c41] : memref<4x256xf32, #tpu.memory_space<vmem>>, vector<4x128xf32>
    %c164 = arith.constant 164 : index
    %c0_104 = arith.constant 0 : index
    %89 = vector.load %arg10[%c164, %c0_104] : memref<256x128xf32, #tpu.memory_space<vmem>>, vector<4x128xf32>
    tpu.vector_store %arg10[%c164, %c0_104], %88 {strides = array<i32>} : memref<256x128xf32, #tpu.memory_space<vmem>>, vector<4x128xf32>,
    %c0_105 = arith.constant 0 : index
    %c42 = arith.constant 42 : index
    %90 = vector.load %arg9[%c0_105, %c42] : memref<4x256xf32, #tpu.memory_space<vmem>>, vector<4x128xf32>
    %c168 = arith.constant 168 : index
    %c0_106 = arith.constant 0 : index
    %91 = vector.load %arg10[%c168, %c0_106] : memref<256x128xf32, #tpu.memory_space<vmem>>, vector<4x128xf32>
    tpu.vector_store %arg10[%c168, %c0_106], %90 {strides = array<i32>} : memref<256x128xf32, #tpu.memory_space<vmem>>, vector<4x128xf32>,
    %c0_107 = arith.constant 0 : index
    %c43 = arith.constant 43 : index
    %92 = vector.load %arg9[%c0_107, %c43] : memref<4x256xf32, #tpu.memory_space<vmem>>, vector<4x128xf32>
    %c172 = arith.constant 172 : index
    %c0_108 = arith.constant 0 : index
    %93 = vector.load %arg10[%c172, %c0_108] : memref<256x128xf32, #tpu.memory_space<vmem>>, vector<4x128xf32>
    tpu.vector_store %arg10[%c172, %c0_108], %92 {strides = array<i32>} : memref<256x128xf32, #tpu.memory_space<vmem>>, vector<4x128xf32>,
    %c0_109 = arith.constant 0 : index
    %c44_110 = arith.constant 44 : index
    %94 = vector.load %arg9[%c0_109, %c44_110] : memref<4x256xf32, #tpu.memory_space<vmem>>, vector<4x128xf32>
    %c176 = arith.constant 176 : index
    %c0_111 = arith.constant 0 : index
    %95 = vector.load %arg10[%c176, %c0_111] : memref<256x128xf32, #tpu.memory_space<vmem>>, vector<4x128xf32>
    tpu.vector_store %arg10[%c176, %c0_111], %94 {strides = array<i32>} : memref<256x128xf32, #tpu.memory_space<vmem>>, vector<4x128xf32>,
    %c0_112 = arith.constant 0 : index
    %c45 = arith.constant 45 : index
    %96 = vector.load %arg9[%c0_112, %c45] : memref<4x256xf32, #tpu.memory_space<vmem>>, vector<4x128xf32>
    %c180 = arith.constant 180 : index
    %c0_113 = arith.constant 0 : index
    %97 = vector.load %arg10[%c180, %c0_113] : memref<256x128xf32, #tpu.memory_space<vmem>>, vector<4x128xf32>
    tpu.vector_store %arg10[%c180, %c0_113], %96 {strides = array<i32>} : memref<256x128xf32, #tpu.memory_space<vmem>>, vector<4x128xf32>,
    %c0_114 = arith.constant 0 : index
    %c46 = arith.constant 46 : index
    %98 = vector.load %arg9[%c0_114, %c46] : memref<4x256xf32, #tpu.memory_space<vmem>>, vector<4x128xf32>
    %c184 = arith.constant 184 : index
    %c0_115 = arith.constant 0 : index
    %99 = vector.load %arg10[%c184, %c0_115] : memref<256x128xf32, #tpu.memory_space<vmem>>, vector<4x128xf32>
    tpu.vector_store %arg10[%c184, %c0_115], %98 {strides = array<i32>} : memref<256x128xf32, #tpu.memory_space<vmem>>, vector<4x128xf32>,
    %c0_116 = arith.constant 0 : index
    %c47 = arith.constant 47 : index
    %100 = vector.load %arg9[%c0_116, %c47] : memref<4x256xf32, #tpu.memory_space<vmem>>, vector<4x128xf32>
    %c188 = arith.constant 188 : index
    %c0_117 = arith.constant 0 : index
    %101 = vector.load %arg10[%c188, %c0_117] : memref<256x128xf32, #tpu.memory_space<vmem>>, vector<4x128xf32>
    tpu.vector_store %arg10[%c188, %c0_117], %100 {strides = array<i32>} : memref<256x128xf32, #tpu.memory_space<vmem>>, vector<4x128xf32>,
    %c0_118 = arith.constant 0 : index
    %c48_119 = arith.constant 48 : index
    %102 = vector.load %arg9[%c0_118, %c48_119] : memref<4x256xf32, #tpu.memory_space<vmem>>, vector<4x128xf32>
    %c192 = arith.constant 192 : index
    %c0_120 = arith.constant 0 : index
    %103 = vector.load %arg10[%c192, %c0_120] : memref<256x128xf32, #tpu.memory_space<vmem>>, vector<4x128xf32>
    tpu.vector_store %arg10[%c192, %c0_120], %102 {strides = array<i32>} : memref<256x128xf32, #tpu.memory_space<vmem>>, vector<4x128xf32>,
    %c0_121 = arith.constant 0 : index
    %c49 = arith.constant 49 : index
    %104 = vector.load %arg9[%c0_121, %c49] : memref<4x256xf32, #tpu.memory_space<vmem>>, vector<4x128xf32>
    %c196 = arith.constant 196 : index
    %c0_122 = arith.constant 0 : index
    %105 = vector.load %arg10[%c196, %c0_122] : memref<256x128xf32, #tpu.memory_space<vmem>>, vector<4x128xf32>
    tpu.vector_store %arg10[%c196, %c0_122], %104 {strides = array<i32>} : memref<256x128xf32, #tpu.memory_space<vmem>>, vector<4x128xf32>,
    %c0_123 = arith.constant 0 : index
    %c50 = arith.constant 50 : index
    %106 = vector.load %arg9[%c0_123, %c50] : memref<4x256xf32, #tpu.memory_space<vmem>>, vector<4x128xf32>
    %c200 = arith.constant 200 : index
    %c0_124 = arith.constant 0 : index
    %107 = vector.load %arg10[%c200, %c0_124] : memref<256x128xf32, #tpu.memory_space<vmem>>, vector<4x128xf32>
    tpu.vector_store %arg10[%c200, %c0_124], %106 {strides = array<i32>} : memref<256x128xf32, #tpu.memory_space<vmem>>, vector<4x128xf32>,
    %c0_125 = arith.constant 0 : index
    %c51 = arith.constant 51 : index
    %108 = vector.load %arg9[%c0_125, %c51] : memref<4x256xf32, #tpu.memory_space<vmem>>, vector<4x128xf32>
    %c204 = arith.constant 204 : index
    %c0_126 = arith.constant 0 : index
    %109 = vector.load %arg10[%c204, %c0_126] : memref<256x128xf32, #tpu.memory_space<vmem>>, vector<4x128xf32>
    tpu.vector_store %arg10[%c204, %c0_126], %108 {strides = array<i32>} : memref<256x128xf32, #tpu.memory_space<vmem>>, vector<4x128xf32>,
    %c0_127 = arith.constant 0 : index
    %c52_128 = arith.constant 52 : index
    %110 = vector.load %arg9[%c0_127, %c52_128] : memref<4x256xf32, #tpu.memory_space<vmem>>, vector<4x128xf32>
    %c208 = arith.constant 208 : index
    %c0_129 = arith.constant 0 : index
    %111 = vector.load %arg10[%c208, %c0_129] : memref<256x128xf32, #tpu.memory_space<vmem>>, vector<4x128xf32>
    tpu.vector_store %arg10[%c208, %c0_129], %110 {strides = array<i32>} : memref<256x128xf32, #tpu.memory_space<vmem>>, vector<4x128xf32>,
    %c0_130 = arith.constant 0 : index
    %c53 = arith.constant 53 : index
    %112 = vector.load %arg9[%c0_130, %c53] : memref<4x256xf32, #tpu.memory_space<vmem>>, vector<4x128xf32>
    %c212 = arith.constant 212 : index
    %c0_131 = arith.constant 0 : index
    %113 = vector.load %arg10[%c212, %c0_131] : memref<256x128xf32, #tpu.memory_space<vmem>>, vector<4x128xf32>
    tpu.vector_store %arg10[%c212, %c0_131], %112 {strides = array<i32>} : memref<256x128xf32, #tpu.memory_space<vmem>>, vector<4x128xf32>,
    %c0_132 = arith.constant 0 : index
    %c54 = arith.constant 54 : index
    %114 = vector.load %arg9[%c0_132, %c54] : memref<4x256xf32, #tpu.memory_space<vmem>>, vector<4x128xf32>
    %c216 = arith.constant 216 : index
    %c0_133 = arith.constant 0 : index
    %115 = vector.load %arg10[%c216, %c0_133] : memref<256x128xf32, #tpu.memory_space<vmem>>, vector<4x128xf32>
    tpu.vector_store %arg10[%c216, %c0_133], %114 {strides = array<i32>} : memref<256x128xf32, #tpu.memory_space<vmem>>, vector<4x128xf32>,
    %c0_134 = arith.constant 0 : index
    %c55 = arith.constant 55 : index
    %116 = vector.load %arg9[%c0_134, %c55] : memref<4x256xf32, #tpu.memory_space<vmem>>, vector<4x128xf32>
    %c220 = arith.constant 220 : index
    %c0_135 = arith.constant 0 : index
    %117 = vector.load %arg10[%c220, %c0_135] : memref<256x128xf32, #tpu.memory_space<vmem>>, vector<4x128xf32>
    tpu.vector_store %arg10[%c220, %c0_135], %116 {strides = array<i32>} : memref<256x128xf32, #tpu.memory_space<vmem>>, vector<4x128xf32>,
    %c0_136 = arith.constant 0 : index
    %c56_137 = arith.constant 56 : index
    %118 = vector.load %arg9[%c0_136, %c56_137] : memref<4x256xf32, #tpu.memory_space<vmem>>, vector<4x128xf32>
    %c224 = arith.constant 224 : index
    %c0_138 = arith.constant 0 : index
    %119 = vector.load %arg10[%c224, %c0_138] : memref<256x128xf32, #tpu.memory_space<vmem>>, vector<4x128xf32>
    tpu.vector_store %arg10[%c224, %c0_138], %118 {strides = array<i32>} : memref<256x128xf32, #tpu.memory_space<vmem>>, vector<4x128xf32>,
    %c0_139 = arith.constant 0 : index
    %c57 = arith.constant 57 : index
    %120 = vector.load %arg9[%c0_139, %c57] : memref<4x256xf32, #tpu.memory_space<vmem>>, vector<4x128xf32>
    %c228 = arith.constant 228 : index
    %c0_140 = arith.constant 0 : index
    %121 = vector.load %arg10[%c228, %c0_140] : memref<256x128xf32, #tpu.memory_space<vmem>>, vector<4x128xf32>
    tpu.vector_store %arg10[%c228, %c0_140], %120 {strides = array<i32>} : memref<256x128xf32, #tpu.memory_space<vmem>>, vector<4x128xf32>,
    %c0_141 = arith.constant 0 : index
    %c58 = arith.constant 58 : index
    %122 = vector.load %arg9[%c0_141, %c58] : memref<4x256xf32, #tpu.memory_space<vmem>>, vector<4x128xf32>
    %c232 = arith.constant 232 : index
    %c0_142 = arith.constant 0 : index
    %123 = vector.load %arg10[%c232, %c0_142] : memref<256x128xf32, #tpu.memory_space<vmem>>, vector<4x128xf32>
    tpu.vector_store %arg10[%c232, %c0_142], %122 {strides = array<i32>} : memref<256x128xf32, #tpu.memory_space<vmem>>, vector<4x128xf32>,
    %c0_143 = arith.constant 0 : index
    %c59 = arith.constant 59 : index
    %124 = vector.load %arg9[%c0_143, %c59] : memref<4x256xf32, #tpu.memory_space<vmem>>, vector<4x128xf32>
    %c236 = arith.constant 236 : index
    %c0_144 = arith.constant 0 : index
    %125 = vector.load %arg10[%c236, %c0_144] : memref<256x128xf32, #tpu.memory_space<vmem>>, vector<4x128xf32>
    tpu.vector_store %arg10[%c236, %c0_144], %124 {strides = array<i32>} : memref<256x128xf32, #tpu.memory_space<vmem>>, vector<4x128xf32>,
    %c0_145 = arith.constant 0 : index
    %c60_146 = arith.constant 60 : index
    %126 = vector.load %arg9[%c0_145, %c60_146] : memref<4x256xf32, #tpu.memory_space<vmem>>, vector<4x128xf32>
    %c240 = arith.constant 240 : index
    %c0_147 = arith.constant 0 : index
    %127 = vector.load %arg10[%c240, %c0_147] : memref<256x128xf32, #tpu.memory_space<vmem>>, vector<4x128xf32>
    tpu.vector_store %arg10[%c240, %c0_147], %126 {strides = array<i32>} : memref<256x128xf32, #tpu.memory_space<vmem>>, vector<4x128xf32>,
    %c0_148 = arith.constant 0 : index
    %c61 = arith.constant 61 : index
    %128 = vector.load %arg9[%c0_148, %c61] : memref<4x256xf32, #tpu.memory_space<vmem>>, vector<4x128xf32>
    %c244 = arith.constant 244 : index
    %c0_149 = arith.constant 0 : index
    %129 = vector.load %arg10[%c244, %c0_149] : memref<256x128xf32, #tpu.memory_space<vmem>>, vector<4x128xf32>
    tpu.vector_store %arg10[%c244, %c0_149], %128 {strides = array<i32>} : memref<256x128xf32, #tpu.memory_space<vmem>>, vector<4x128xf32>,
    %c0_150 = arith.constant 0 : index
    %c62 = arith.constant 62 : index
    %130 = vector.load %arg9[%c0_150, %c62] : memref<4x256xf32, #tpu.memory_space<vmem>>, vector<4x128xf32>
    %c248 = arith.constant 248 : index
    %c0_151 = arith.constant 0 : index
    %131 = vector.load %arg10[%c248, %c0_151] : memref<256x128xf32, #tpu.memory_space<vmem>>, vector<4x128xf32>
    tpu.vector_store %arg10[%c248, %c0_151], %130 {strides = array<i32>} : memref<256x128xf32, #tpu.memory_space<vmem>>, vector<4x128xf32>,
    %c0_152 = arith.constant 0 : index
    %c63 = arith.constant 63 : index
    %132 = vector.load %arg9[%c0_152, %c63] : memref<4x256xf32, #tpu.memory_space<vmem>>, vector<4x128xf32>
    %c252 = arith.constant 252 : index
    %c0_153 = arith.constant 0 : index
    %133 = vector.load %arg10[%c252, %c0_153] : memref<256x128xf32, #tpu.memory_space<vmem>>, vector<4x128xf32>
    tpu.vector_store %arg10[%c252, %c0_153], %132 {strides = array<i32>} : memref<256x128xf32, #tpu.memory_space<vmem>>, vector<4x128xf32>,
    %c0_154 = arith.constant 0 : index
    %c0_155 = arith.constant 0 : index
    %134 = vector.load %arg2[%c0_154, %c0_155] : memref<8x256xf32, #tpu.memory_space<vmem>>, vector<8x256xf32>
    %c0_156 = arith.constant 0 : index
    %c0_157 = arith.constant 0 : index
    %135 = vector.load %arg10[%c0_156, %c0_157] : memref<256x128xf32, #tpu.memory_space<vmem>>, vector<256x128xf32>
    %cst = arith.constant dense<0.000000e+00> : vector<8x128xf32>
    %136 = tpu.matmul %134, %135, %cst {dimension_numbers = #tpu.dot_dimension_numbers<[1], [0], [0], [1], [0, 0, 1, 1], [], []>} : vector<8x256xf32>, vector<256x128xf32>, vector<8x128xf32> -> vector<8x128xf32>
    %c0_158 = arith.constant 0 : index
    %c0_159 = arith.constant 0 : index
    %137 = vector.load %arg3[%c0_158, %c0_159] : memref<8x1xf32, #tpu.memory_space<vmem>>, vector<8x1xf32>
    %138 = vector.broadcast %137 : vector<8x1xf32> to vector<8x128xf32>
    %139 = arith.addf %136, %138 : vector<8x128xf32>
    %cst_160 = arith.constant 0.000000e+00 : f32
    %140 = vector.broadcast %cst_160 : f32 to vector<8x128xf32>
    %141 = arith.maximumf %139, %140 : vector<8x128xf32>
    %c0_161 = arith.constant 0 : index
    %c0_162 = arith.constant 0 : index
    %142 = vector.load %arg4[%c0_161, %c0_162] : memref<1x8xf32, #tpu.memory_space<vmem>>, vector<1x8xf32>
    %cst_163 = arith.constant dense<0.000000e+00> : vector<1x128xf32>
    %143 = tpu.matmul %142, %141, %cst_163 {dimension_numbers = #tpu.dot_dimension_numbers<[1], [0], [0], [1], [0, 0, 1, 1], [], []>} : vector<1x8xf32>, vector<8x128xf32>, vector<1x128xf32> -> vector<1x128xf32>
    %c0_164 = arith.constant 0 : index
    %c0_165 = arith.constant 0 : index
    %144 = vector.load %arg5[%c0_164, %c0_165] : memref<1x1xf32, #tpu.memory_space<vmem>>, vector<1x1xf32>
    %145 = vector.broadcast %144 : vector<1x1xf32> to vector<1x128xf32>
    %146 = arith.addf %143, %145 : vector<1x128xf32>
    %cst_166 = arith.constant 0.000000e+00 : f32
    %147 = vector.broadcast %cst_166 : f32 to vector<1x128xf32>
    %148 = arith.subf %147, %146 : vector<1x128xf32>
    %149 = math.exp %148 : vector<1x128xf32>
    %cst_167 = arith.constant 1.000000e+00 : f32
    %150 = vector.broadcast %cst_167 : f32 to vector<1x128xf32>
    %151 = arith.addf %150, %149 : vector<1x128xf32>
    %152 = tpu.reciprocal %151 : vector<1x128xf32> -> vector<1x128xf32>
    %cst_168 = arith.constant 1.000000e+00 : f32
    %153 = vector.broadcast %cst_168 : f32 to vector<1x128xf32>
    %154 = arith.subf %153, %152 : vector<1x128xf32>
    %155 = tpu.concatenate %154, %152 in 0 : vector<1x128xf32>, vector<1x128xf32> -> vector<2x128xf32>
    %c0_169 = arith.constant 0 : index
    %c0_170 = arith.constant 0 : index
    %c0_171 = arith.constant 0 : index
    %156 = vector.load %arg8[%c0_169, %c0_170, %c0_171] : memref<1x2x128xf32, #tpu.memory_space<vmem>>, vector<1x2x128xf32>
    %157 = vector.shape_cast %156 : vector<1x2x128xf32> to vector<2x128xf32>
    %158 = vector.shape_cast %155 : vector<2x128xf32> to vector<1x2x128xf32>
    tpu.vector_store %arg8[%c0_169, %c0_170, %c0_171], %158 {strides = array<i32>} : memref<1x2x128xf32, #tpu.memory_space<vmem>>, vector<1x2x128xf32>,
    return
  }
  func.func @transform_0(%arg0: i32, %arg1: i32) -> (i32, i32) {
    %c0_i32 = arith.constant 0 : i32
    %c0_i32_0 = arith.constant 0 : i32
    %c0_i32_1 = arith.constant 0 : i32
    return %c0_i32, %c0_i32_0 : i32, i32
  }
  func.func @transform_1(%arg0: i32, %arg1: i32) -> (i32, i32) {
    %c0_i32 = arith.constant 0 : i32
    %c0_i32_0 = arith.constant 0 : i32
    %c0_i32_1 = arith.constant 0 : i32
    return %c0_i32, %c0_i32_0 : i32, i32
  }
  func.func @transform_2(%arg0: i32, %arg1: i32) -> (i32, i32) {
    %c0_i32 = arith.constant 0 : i32
    %c0_i32_0 = arith.constant 0 : i32
    %c0_i32_1 = arith.constant 0 : i32
    return %c0_i32, %c0_i32_0 : i32, i32
  }
  func.func @transform_3(%arg0: i32, %arg1: i32) -> (i32, i32) {
    %c0_i32 = arith.constant 0 : i32
    %c0_i32_0 = arith.constant 0 : i32
    %c0_i32_1 = arith.constant 0 : i32
    return %c0_i32, %c0_i32_0 : i32, i32
  }
  func.func @transform_4(%arg0: i32, %arg1: i32) -> (i32, i32, i32) {
    %c0_i32 = arith.constant 0 : i32
    %c0_i32_0 = arith.constant 0 : i32
    return %arg0, %c0_i32, %arg1 : i32, i32, i32
  }
  func.func @transform_5(%arg0: i32, %arg1: i32) -> (i32, i32, i32) {
    %c1_i32 = arith.constant 1 : i32
    %0 = arith.addi %arg1, %c1_i32 : i32
    %c1_i32_0 = arith.constant 1 : i32
    %1 = arith.muli %0, %c1_i32_0 : i32
    %c0_i32 = arith.constant 0 : i32
    %c0_i32_1 = arith.constant 0 : i32
    return %arg0, %c0_i32, %1 : i32, i32, i32
  }
  func.func @transform_6(%arg0: i32, %arg1: i32) -> (i32, i32, i32) {
    %c0_i32 = arith.constant 0 : i32
    %c0_i32_0 = arith.constant 0 : i32
    return %arg0, %c0_i32, %arg1 : i32, i32, i32
  }
}

</mosaic_0001>

<bundles_post_ra>
// kernel: tpu_custom_call.1
= control target key start
LH: loop header
LB: loop body
LE: loop exit
PB: predicated region body
PF: predicated region fallthrough
CT: control target
= control target key end

     0   :  { %s2177_s0 = inlined_call_operand.hbm [shape: f32[8,256], index: 0, kind: input, shape index: {}]   ;;  %s2178_s1 = inlined_call_operand.vmem [shape: f32[8,1], index: 1, kind: input, shape index: {}]   ;;  %s2179_s2 = inlined_call_operand.vmem [shape: f32[1,8], index: 2, kind: input, shape index: {}]   ;;  %s2180_s3 = inlined_call_operand.<no memory space> [shape: f32[1,1], index: 3, kind: input, shape index: {}]   ;;  %s2181_s4 = inlined_call_operand.hbm [shape: f32[2,4,256], index: 4, kind: input, shape index: {}]   ;;  %s2182_s5 = inlined_call_operand.hbm [shape: f32[2,4,256], index: 5, kind: input, shape index: {}]   ;;  %s2183_s6 = inlined_call_operand.hbm [shape: f32[2,2,128], index: 6, kind: output, shape index: {}]  }
   0x1   :  { %2184 = sst [smem:[#allocation15_spill]] %s2181_s4  ;;  %v11_v0 = vstv %s2180_s3 }
   0x2   :  { %12 = vst [vmem:[#allocation4] sm:$0x1] %v11_v0 }
   0x3   :  { %13 = vsyncpa [#allocation6], 0 }
   0x4   :  { %14 = vsyncpa [#allocation9], 0 }
   0x5   :  { %16 = vsyncpa [#allocation9 + $0x1], 0 }
   0x6   :  { %17 = vsyncpa [#allocation7], 0 }
   0x7   :  { %19 = vsyncpa [#allocation7 + $0x1], 0  ;;  %s1896_s23 = smov 0   ;;  %s1898_s24 = smov 0  }
   0x8   :  { %s1900_s25 = smov 0   ;;  %s1902_s26 = smov 0  }
   0x9   :  { %s1904_s27 = smov 0   ;;  %s1906_s28 = smov 0  }
   0xa LB: > { %s37_s3 = sadd.s32 1, %s1787_s27  ;;  %s130_s29 = sadd.s32 1, %s1779_s25  ;;  %s1791_s28 = sphi %s1906_s28, %s25_s28   ;;  %s1787_s27 = sphi %s1904_s27, %s2196_s27   ;;  %s1783_s26 = sphi %s1902_s26, %s2195_s26   ;;  %s1779_s25 = sphi %s1900_s25, %s2194_s25   ;;  %s1775_s24 = sphi %s1898_s24, %s2193_s24   ;;  %s1771_s23 = sphi %s1896_s23, %s2192_s23  }
   0xb   : > { %p39_p0 = scmp.ge.s32.totalorder %s37_s3, 2  ;;  %p137_p1 = scmp.ne.s32.totalorder %s1779_s25, %s1775_s24 }
   0xc   : > { %p138_p2 = scmp.eq.s32.totalorder %s1791_s28, 0  ;;  %p1448_p3 = scmp.ge.s32.totalorder %s1791_s28, 2 }
   0xd   : > { %s2198_s3 = smov (%p39_p0, %s37_s3), 0  ;;  %p1493_p5 = scmp.lt.s32.totalorder %s1791_s28, 2 }
   0xe   : > { %p1937_p4 = por %p138_p2, %p137_p1  ;;  %s125_s7 = ssub.s32 %s1787_s27, %s2198_s3 }
   0xf   : > { %s246_s8 = sand.u32 1, %s1791_s28   ;;  %p128_p6 = scmp.eq.s32.totalorder %s125_s7, 0 }
  0x10   : > { %s248_s9 = sand.u32 1, %s1779_s25   ;;  %s1465_s10 = sshll.u32 %s1787_s27, 3 }
  0x11   : > { %s1948_s11 = scalar_select %p128_p6, %s1779_s25, %s130_s29  }
  0x12   : > { %s1950_s12 = sshll.u32 %s248_s9, 2  ;;  %s2186_s4 = sld [smem:[#allocation15_spill]] }
  0x13   : > { %s250_s17 = scalar_lea.vmem [#allocation8], %s1950_s12  ;;  %p1960_p7 = pnand %p1493_p5, %p1937_p4 }
  0x14   : > { %s260_s18 = sshll.u32 %s250_s17, 4  ;;  %s1368_s22 = scalar_lea.hbm %s2182_s5, %s1465_s10  ;;  %s261_s18 = int_to_ptr.vmem [resolvable:$true] %s260_s18 }
  0x15   : > { %s1967_s29 = scalar_lea.sflag [#allocation9], %s246_s8  ;;  %s1973_s7 = sadd.s32 4294967295, %s1791_s28  }
  0x16   : > { %s1445_s30 = sadd.s32 4294967294, %s1791_s28   ;;  %p143_p8 = scmp.ne.s32.totalorder %s1775_s24, %s1771_s23 }
  0x17   : > { %p144_p9 = scmp.eq.s32.totalorder %s1973_s7, 0  ;;  %p199_p10 = scmp.eq.s32.totalorder %s1973_s7, 1 }
  0x18   : > { %s256_s15 = scalar_lea.hbm %s2186_s4, %s1465_s10  ;;  %p205_p11 = scmp.eq.s32.totalorder %s1445_s30, 1 }
  0x19   : > { %s258_s16 = sshll.u32 %s256_s15, 4  ;;  %p1446_p12 = scmp.ge.s32.totalorder %s1791_s28, 1  ;;  %s259_s16 = int_to_ptr.hbm [resolvable:$true] %s258_s16 }
  0x1a   : > { %1484 = dma.hbm_to_vmem [thread:$0]  (!%p1960_p7), %s259_s16, 64, %s261_s18, %s1967_s29  }
  0x1b   : > { %p1983_p13 = por %p144_p9, %p143_p8  ;;  %p1990_p0 = por %p199_p10, %p137_p1 }
  0x1c   : > { %p1994_p2 = por %p205_p11, %p143_p8  ;;  %p212_p4 = scmp.lt.s32.totalorder %s1791_s28, 3 }
  0x1d   : > { %s224_s16 = sshll.u32 %s2177_s0, 4  ;;  %s1369_s17 = scalar_lea.hbm %s1368_s22, 4  ;;  %s225_s16 = int_to_ptr.hbm [resolvable:$true] %s224_s16 }
  0x1e   : > { %p1999_p5 = pnand %p1446_p12, %p212_p4  ;;  %s1793_s18 = smov [#allocation5]  }
  0x1f   : > { %s226_s20 = sshll.u32 %s1793_s18, 4  ;;  %s280_s21 = sshll.u32 %s1369_s17, 4  ;;  %s227_s20 = int_to_ptr.vmem [resolvable:$true] %s226_s20  ;;  %s281_s21 = int_to_ptr.hbm [resolvable:$true] %s280_s21 }
  0x20   : > { %p1477_p1 = pneg %p1999_p5  ;;  %s271_s30 = scalar_lea.vmem [#allocation10], %s1950_s12 }
  0x21   : > { %s282_s4 = sshll.u32 %s271_s30, 4  ;;  %291 = sbr.rel (%p1999_p5) target bundleno = 1015 (0x3f7), region = 44  ;;  %s283_s4 = int_to_ptr.vmem [resolvable:$true] %s282_s4 }
  0x22   : > { %p1478_p6 = pnand %p1477_p1, %p144_p9 }
  0x23   : > { %1487 = dma.hbm_to_vmem [thread:$0]  (!%p1960_p7), %s281_s21, 64, %s283_s4, %s1967_s29  }
  0x24   : > { %1480 = dma.hbm_to_vmem [thread:$0]  (!%p1478_p6), %s225_s16, 256, %s227_s20, [#allocation6]  }
  0x26   : > { %1758 = dma.done.wait (%p144_p9), [#allocation6], 256  }
  0x27   : > { %1760 = vsyncadd (%p144_p9), [#allocation6], 4294967040  ;;  %s298_s22 = sand.u32 1, %s1973_s7   ;;  %s2022_s14 = sand.u32 1, %s1775_s24  }
  0x28   : > { %s1457_s12 = sshll.u32 %s2022_s14, 2  ;;  %s299_s15 = scalar_lea.sflag [#allocation9], %s298_s22 }
  0x29   : > { %s302_s19 = scalar_lea.vmem [#allocation8], %s1457_s12 }
  0x2a   : > { %1762 = dma.done.wait (%p1983_p13), %s299_s15, 128  }
  0x2b   : > { %1764 = vsyncadd (%p1983_p13), %s299_s15, 4294967168  ;;  %v348_v1 = vld [vmem:[%s302_s19] sm:$0xf]  ;;  %s312_s4 = scalar_lea.vmem [#allocation10], %s1457_s12  ;;  %s1794_s29 = smov 127   ;;  %vm376_vm0 = vcmask 1031168  }
  0x2c   : > { %v350_v2 = vld [vmem:[%s312_s4] sm:$0xf]  ;;  %349 = vst [vmem:[#allocation2] sm:$0xf] %v348_v1  ;;  %s1795_s7 = smov 126   ;;  %s1796_s8 = smov 125  }
  0x2d   : > { %351 = vst [vmem:[#allocation2 + $0x4] sm:$0xf] %v350_v2  ;;  %s1797_s13 = smov 124   ;;  %s1798_s16 = smov 123   ;;  %vm363_vm1 = vcmask 1039360   ;;  %vm389_vm2 = vcmask 1022976  }
  0x2e   : > { %s1799_s17 = smov 122   ;;  %s1800_s18 = smov 121   ;;  %vm402_vm3 = vcmask 1014784   ;;  %vm415_vm4 = vcmask 1006592   ;;  %vm428_vm5 = vcmask 998400   ;;  %vm441_vm6 = vcmask 990208  }
  0x2f   : > { %s1801_s20 = smov 120   ;;  %s1802_s21 = smov 119   ;;  %vm454_vm7 = vcmask 982016   ;;  %vm467_vm8 = vcmask 973824   ;;  %vm480_vm9 = vcmask 965632   ;;  %vm493_vm10 = vcmask 957440  }
  0x30   : > { %s1803_s30 = smov 118   ;;  %s1804_s22 = smov 117   ;;  %vm506_vm11 = vcmask 949248   ;;  %vm519_vm12 = vcmask 941056   ;;  %vm532_vm13 = vcmask 932864   ;;  %vm545_vm14 = vcmask 924672  }
  0x31   : > { %s1805_s12 = smov 116   ;;  %s1806_s15 = smov 115   ;;  %vm558_vm15 = vcmask 916480  }
  0x32   : > { %s1807_s19 = smov 114   ;;  %s1808_s4 = smov 113  }
  0x34   : > { %v2029_v3 = vld [vmem:[#allocation2] sm:$0xff] }
  0x35   : > { %356 = vst [vmem:[#allocation1] ss:$2 sm:$0xff] %v2029_v3 }
  0x3c   : > { %v357_v4 = vld.sshfl [vmem:[#allocation1] sm:$0xff pattern:$0x75316420]  ;;  %v358_v5 = vld.sshfl [vmem:[#allocation1 + $0x8] sm:$0xff pattern:$0x75316420] }
  0x3d   : > { %369 = vst [vmem:[#allocation1] ss:$2 sm:$0xff] %v2029_v3  ;;  %359 = vrot.lane.b32.xlu0 %v357_v4, %s1794_s29 }
  0x44   : > { %v370_v6 = vld.sshfl [vmem:[#allocation1] sm:$0xff pattern:$0x75316420]  ;;  %v371_v7 = vld.sshfl [vmem:[#allocation1 + $0x8] sm:$0xff pattern:$0x75316420] }
  0x45   : > { %372 = vrot.lane.b32.xlu1 %v370_v6, %s1795_s7  ;;  %361 = vrot.lane.b32.xlu0 %v358_v5, %s1794_s29  ;;  %382 = vst [vmem:[#allocation1] ss:$2 sm:$0xff] %v2029_v3  ;;  %s1809_s29 = smov 112  }
  0x4c   : > { %v383_v8 = vld.sshfl [vmem:[#allocation1] sm:$0xff pattern:$0x75316420]  ;;  %v384_v9 = vld.sshfl [vmem:[#allocation1 + $0x8] sm:$0xff pattern:$0x75316420] }
  0x4d   : > { %374 = vrot.lane.b32.xlu1 %v371_v7, %s1795_s7  ;;  %387 = vrot.lane.b32.xlu2 %v384_v9, %s1796_s8  ;;  %395 = vst [vmem:[#allocation1] ss:$2 sm:$0xff] %v2029_v3  ;;  %s1810_s7 = smov 111  }
  0x54   : > { %v397_v10 = vld.sshfl [vmem:[#allocation1 + $0x8] sm:$0xff pattern:$0x75316420]  ;;  %v396_v11 = vld.sshfl [vmem:[#allocation1] sm:$0xff pattern:$0x75316420] }
  0x55   : > { %385 = vrot.lane.b32.xlu1 %v383_v8, %s1796_s8  ;;  %400 = vrot.lane.b32.xlu0 %v397_v10, %s1797_s13  ;;  %408 = vst [vmem:[#allocation1] ss:$2 sm:$0xff] %v2029_v3  ;;  %s1811_s8 = smov 110  }
  0x56   : > { %398 = vrot.lane.b32.xlu2 %v396_v11, %s1797_s13  ;;  %s1812_s13 = smov 109  }
  0x5c   : > { %v409_v12 = vld.sshfl [vmem:[#allocation1] sm:$0xff pattern:$0x75316420]  ;;  %v410_v13 = vld.sshfl [vmem:[#allocation1 + $0x8] sm:$0xff pattern:$0x75316420] }
  0x5d   : > { %411 = vrot.lane.b32.xlu1 %v409_v12, %s1798_s16  ;;  %421 = vst [vmem:[#allocation1] ss:$2 sm:$0xff] %v2029_v3 }
  0x5e   : > { %413 = vrot.lane.b32.xlu2 %v410_v13, %s1798_s16  ;;  %s1813_s16 = smov 108  }
  0x64   : > { %v423_v14 = vld.sshfl [vmem:[#allocation1 + $0x8] sm:$0xff pattern:$0x75316420]  ;;  %v422_v15 = vld.sshfl [vmem:[#allocation1] sm:$0xff pattern:$0x75316420] }
  0x65   : > { %426 = vrot.lane.b32.xlu1 %v423_v14, %s1799_s17  ;;  %424 = vrot.lane.b32.xlu0 %v422_v15, %s1799_s17  ;;  %434 = vst [vmem:[#allocation1] ss:$2 sm:$0xff] %v2029_v3  ;;  %s1814_s17 = smov 107  }
  0x6c   : > { %v436_v16 = vld.sshfl [vmem:[#allocation1 + $0x8] sm:$0xff pattern:$0x75316420]  ;;  %v435_v17 = vld.sshfl [vmem:[#allocation1] sm:$0xff pattern:$0x75316420] }
  0x6d   : > { %439 = vrot.lane.b32.xlu0 %v436_v16, %s1800_s18  ;;  %447 = vst [vmem:[#allocation1] ss:$2 sm:$0xff] %v2029_v3  ;;  %437 = vrot.lane.b32.xlu2 %v435_v17, %s1800_s18  ;;  %s1815_s18 = smov 106  }
  0x74   : > { %v448_v18 = vld.sshfl [vmem:[#allocation1] sm:$0xff pattern:$0x75316420]  ;;  %v449_v19 = vld.sshfl [vmem:[#allocation1 + $0x8] sm:$0xff pattern:$0x75316420] }
  0x75   : > { %450 = vrot.lane.b32.xlu1 %v448_v18, %s1801_s20  ;;  %460 = vst [vmem:[#allocation1] ss:$2 sm:$0xff] %v2029_v3  ;;  %452 = vrot.lane.b32.xlu2 %v449_v19, %s1801_s20  ;;  %s1816_s20 = smov 105  }
  0x7c   : > { %v462_v20 = vld.sshfl [vmem:[#allocation1 + $0x8] sm:$0xff pattern:$0x75316420]  ;;  %v461_v21 = vld.sshfl [vmem:[#allocation1] sm:$0xff pattern:$0x75316420] }
  0x7d   : > { %465 = vrot.lane.b32.xlu1 %v462_v20, %s1802_s21  ;;  %463 = vrot.lane.b32.xlu0 %v461_v21, %s1802_s21  ;;  %473 = vst [vmem:[#allocation1] ss:$2 sm:$0xff] %v2029_v3  ;;  %s1817_s21 = smov 104  }
  0x84   : > { %v475_v22 = vld.sshfl [vmem:[#allocation1 + $0x8] sm:$0xff pattern:$0x75316420]  ;;  %v474_v23 = vld.sshfl [vmem:[#allocation1] sm:$0xff pattern:$0x75316420] }
  0x85   : > { %478 = vrot.lane.b32.xlu0 %v475_v22, %s1803_s30  ;;  %486 = vst [vmem:[#allocation1] ss:$2 sm:$0xff] %v2029_v3  ;;  %476 = vrot.lane.b32.xlu2 %v474_v23, %s1803_s30  ;;  %s1818_s30 = smov 103  }
  0x8c   : > { %v487_v24 = vld.sshfl [vmem:[#allocation1] sm:$0xff pattern:$0x75316420]  ;;  %v488_v25 = vld.sshfl [vmem:[#allocation1 + $0x8] sm:$0xff pattern:$0x75316420] }
  0x8d   : > { %489 = vrot.lane.b32.xlu1 %v487_v24, %s1804_s22  ;;  %499 = vst [vmem:[#allocation1] ss:$2 sm:$0xff] %v2029_v3  ;;  %491 = vrot.lane.b32.xlu2 %v488_v25, %s1804_s22  ;;  %s1819_s22 = smov 102  }
  0x94   : > { %v501_v26 = vld.sshfl [vmem:[#allocation1 + $0x8] sm:$0xff pattern:$0x75316420]  ;;  %v500_v27 = vld.sshfl [vmem:[#allocation1] sm:$0xff pattern:$0x75316420] }
  0x95   : > { %504 = vrot.lane.b32.xlu1 %v501_v26, %s1805_s12  ;;  %502 = vrot.lane.b32.xlu0 %v500_v27, %s1805_s12  ;;  %512 = vst [vmem:[#allocation1] ss:$2 sm:$0xff] %v2029_v3  ;;  %s1820_s12 = smov 101  }
  0x9c   : > { %v514_v28 = vld.sshfl [vmem:[#allocation1 + $0x8] sm:$0xff pattern:$0x75316420]  ;;  %v513_v29 = vld.sshfl [vmem:[#allocation1] sm:$0xff pattern:$0x75316420] }
  0x9d   : > { %517 = vrot.lane.b32.xlu0 %v514_v28, %s1806_s15  ;;  %525 = vst [vmem:[#allocation1] ss:$2 sm:$0xff] %v2029_v3  ;;  %515 = vrot.lane.b32.xlu2 %v513_v29, %s1806_s15  ;;  %s1821_s15 = smov 100  }
  0xa4   : > { %v526_v30 = vld.sshfl [vmem:[#allocation1] sm:$0xff pattern:$0x75316420]  ;;  %v527_v31 = vld.sshfl [vmem:[#allocation1 + $0x8] sm:$0xff pattern:$0x75316420] }
  0xa5   : > { %528 = vrot.lane.b32.xlu1 %v526_v30, %s1807_s19  ;;  %538 = vst [vmem:[#allocation1] ss:$2 sm:$0xff] %v2029_v3  ;;  %530 = vrot.lane.b32.xlu2 %v527_v31, %s1807_s19  ;;  %s1822_s19 = smov 99  }
  0xa7   : > { %v388_v46 = vpop.permute.xlu2 %387 }
  0xac   : > { %v540_v32 = vld.sshfl [vmem:[#allocation1 + $0x8] sm:$0xff pattern:$0x75316420]  ;;  %v539_v33 = vld.sshfl [vmem:[#allocation1] sm:$0xff pattern:$0x75316420] }
  0xad   : > { %543 = vrot.lane.b32.xlu1 %v540_v32, %s1808_s4  ;;  %541 = vrot.lane.b32.xlu0 %v539_v33, %s1808_s4  ;;  %551 = vst [vmem:[#allocation1] ss:$2 sm:$0xff] %v2029_v3  ;;  %s1823_s4 = smov 98  }
  0xaf   : > { %v360_v43 = vpop.permute.xlu0 %359 }
  0xb0   : > { %v399_v53 = vpop.permute.xlu2 %398 }
  0xb4   : > { %v553_v34 = vld.sshfl [vmem:[#allocation1 + $0x8] sm:$0xff pattern:$0x75316420]  ;;  %v552_v35 = vld.sshfl [vmem:[#allocation1] sm:$0xff pattern:$0x75316420] }
  0xb5   : > { %556 = vrot.lane.b32.xlu0 %v553_v34, %s1809_s29  ;;  %564 = vst [vmem:[#allocation1] ss:$2 sm:$0xff] %v2029_v3  ;;  %554 = vrot.lane.b32.xlu2 %v552_v35, %s1809_s29  ;;  %s1824_s29 = smov 97  }
  0xb7   : > { %v373_v38 = vpop.permute.xlu1 %372  ;;  %v362_v49 = vpop.permute.xlu0 %361 }
  0xb8   : > { %v364_v51 = vsel %vm363_vm1, %v360_v43, %v362_v49  ;;  %v414_v58 = vpop.permute.xlu2 %413  ;;  %vm584_vm1 = vcmask 900096  }
  0xb9   : > { %366 = vst [vmem:[#allocation3 + $0x4] sm:$0xf] %v364_v51 }
  0xbc   : > { %v565_v36 = vld.sshfl [vmem:[#allocation1] sm:$0xff pattern:$0x75316420]  ;;  %v566_v37 = vld.sshfl [vmem:[#allocation1 + $0x8] sm:$0xff pattern:$0x75316420] }
  0xbd   : > { %567 = vrot.lane.b32.xlu1 %v565_v36, %s1810_s7  ;;  %577 = vst [vmem:[#allocation1] ss:$2 sm:$0xff] %v2029_v3  ;;  %569 = vrot.lane.b32.xlu2 %v566_v37, %s1810_s7  ;;  %s1825_s7 = smov 90  }
  0xbf   : > { %v375_v44 = vpop.permute.xlu1 %374 }
  0xc0   : > { %v377_v45 = vsel %vm376_vm0, %v373_v38, %v375_v44  ;;  %vm571_vm0 = vcmask 908288  }
  0xc1   : > { %379 = vst [vmem:[#allocation3 + $0x8] sm:$0xf] %v377_v45 }
  0xc4   : > { %v579_v39 = vld.sshfl [vmem:[#allocation1 + $0x8] sm:$0xff pattern:$0x75316420]  ;;  %v578_v40 = vld.sshfl [vmem:[#allocation1] sm:$0xff pattern:$0x75316420] }
  0xc5   : > { %582 = vrot.lane.b32.xlu1 %v579_v39, %s1811_s8  ;;  %580 = vrot.lane.b32.xlu0 %v578_v40, %s1811_s8  ;;  %590 = vst [vmem:[#allocation1] ss:$2 sm:$0xff] %v2029_v3  ;;  %s1826_s8 = smov 89  }
  0xc7   : > { %v386_v50 = vpop.permute.xlu1 %385  ;;  %v401_v59 = vpop.permute.xlu0 %400 }
  0xc8   : > { %v390_v52 = vsel %vm389_vm2, %v386_v50, %v388_v46  ;;  %v403_v61 = vsel %vm402_vm3, %v399_v53, %v401_v59  ;;  %v438_v5 = vpop.permute.xlu2 %437  ;;  %vm597_vm2 = vcmask 891904   ;;  %vm610_vm3 = vcmask 883712  }
  0xc9   : > { %392 = vst [vmem:[#allocation3 + $0xc] sm:$0xf] %v390_v52 }
  0xca   : > { %405 = vst [vmem:[#allocation3 + $0x10] sm:$0xf] %v403_v61 }
  0xcc   : > { %v592_v41 = vld.sshfl [vmem:[#allocation1 + $0x8] sm:$0xff pattern:$0x75316420]  ;;  %v591_v42 = vld.sshfl [vmem:[#allocation1] sm:$0xff pattern:$0x75316420] }
  0xcd   : > { %595 = vrot.lane.b32.xlu0 %v592_v41, %s1812_s13  ;;  %603 = vst [vmem:[#allocation1] ss:$2 sm:$0xff] %v2029_v3  ;;  %593 = vrot.lane.b32.xlu2 %v591_v42, %s1812_s13  ;;  %s1827_s13 = smov 88  }
  0xcf   : > { %v412_v60 = vpop.permute.xlu1 %411 }
  0xd0   : > { %v416_v62 = vsel %vm415_vm4, %v412_v60, %v414_v58  ;;  %v453_v10 = vpop.permute.xlu2 %452  ;;  %vm623_vm4 = vcmask 875520  }
  0xd1   : > { %418 = vst [vmem:[#allocation3 + $0x14] sm:$0xf] %v416_v62 }
  0xd4   : > { %v604_v47 = vld.sshfl [vmem:[#allocation1] sm:$0xff pattern:$0x75316420]  ;;  %v605_v48 = vld.sshfl [vmem:[#allocation1 + $0x8] sm:$0xff pattern:$0x75316420] }
  0xd5   : > { %606 = vrot.lane.b32.xlu1 %v604_v47, %s1813_s16  ;;  %616 = vst [vmem:[#allocation1] ss:$2 sm:$0xff] %v2029_v3  ;;  %608 = vrot.lane.b32.xlu2 %v605_v48, %s1813_s16  ;;  %s1828_s16 = smov 87  }
  0xd7   : > { %v427_v1 = vpop.permute.xlu1 %426  ;;  %v425_v2 = vpop.permute.xlu0 %424 }
  0xd8   : > { %v429_v4 = vsel %vm428_vm5, %v425_v2, %v427_v1  ;;  %vm636_vm5 = vcmask 867328  }
  0xd9   : > { %431 = vst [vmem:[#allocation3 + $0x18] sm:$0xf] %v429_v4 }
  0xdc   : > { %v618_v54 = vld.sshfl [vmem:[#allocation1 + $0x8] sm:$0xff pattern:$0x75316420]  ;;  %v617_v55 = vld.sshfl [vmem:[#allocation1] sm:$0xff pattern:$0x75316420] }
  0xdd   : > { %621 = vrot.lane.b32.xlu1 %v618_v54, %s1814_s17  ;;  %619 = vrot.lane.b32.xlu0 %v617_v55, %s1814_s17  ;;  %629 = vst [vmem:[#allocation1] ss:$2 sm:$0xff] %v2029_v3  ;;  %s1829_s17 = smov 86  }
  0xdf   : > { %v440_v11 = vpop.permute.xlu0 %439  ;;  %v477_v17 = vpop.permute.xlu2 %476 }
  0xe0   : > { %v442_v13 = vsel %vm441_vm6, %v438_v5, %v440_v11  ;;  %vm649_vm6 = vcmask 859136  }
  0xe1   : > { %444 = vst [vmem:[#allocation3 + $0x1c] sm:$0xf] %v442_v13 }
  0xe4   : > { %v631_v56 = vld.sshfl [vmem:[#allocation1 + $0x8] sm:$0xff pattern:$0x75316420]  ;;  %v630_v57 = vld.sshfl [vmem:[#allocation1] sm:$0xff pattern:$0x75316420] }
  0xe5   : > { %634 = vrot.lane.b32.xlu0 %v631_v56, %s1815_s18  ;;  %642 = vst [vmem:[#allocation1] ss:$2 sm:$0xff] %v2029_v3  ;;  %632 = vrot.lane.b32.xlu2 %v630_v57, %s1815_s18  ;;  %s1830_s18 = smov 85  }
  0xe7   : > { %v451_v12 = vpop.permute.xlu1 %450  ;;  %v492_v22 = vpop.permute.xlu2 %491 }
  0xe8   : > { %v455_v14 = vsel %vm454_vm7, %v451_v12, %v453_v10  ;;  %vm662_vm7 = vcmask 850944  }
  0xe9   : > { %457 = vst [vmem:[#allocation3 + $0x20] sm:$0xf] %v455_v14 }
  0xec   : > { %v643_v63 = vld.sshfl [vmem:[#allocation1] sm:$0xff pattern:$0x75316420]  ;;  %v644_v0 = vld.sshfl [vmem:[#allocation1 + $0x8] sm:$0xff pattern:$0x75316420] }
  0xed   : > { %645 = vrot.lane.b32.xlu1 %v643_v63, %s1816_s20  ;;  %655 = vst [vmem:[#allocation1] ss:$2 sm:$0xff] %v2029_v3  ;;  %647 = vrot.lane.b32.xlu2 %v644_v0, %s1816_s20  ;;  %s1831_s20 = smov 84  }
  0xef   : > { %v466_v20 = vpop.permute.xlu1 %465  ;;  %v464_v21 = vpop.permute.xlu0 %463 }
  0xf0   : > { %v468_v25 = vsel %vm467_vm8, %v464_v21, %v466_v20  ;;  %vm675_vm8 = vcmask 842752  }
  0xf1   : > { %470 = vst [vmem:[#allocation3 + $0x24] sm:$0xf] %v468_v25 }
  0xf4   : > { %v657_v6 = vld.sshfl [vmem:[#allocation1 + $0x8] sm:$0xff pattern:$0x75316420]  ;;  %v656_v7 = vld.sshfl [vmem:[#allocation1] sm:$0xff pattern:$0x75316420] }
  0xf5   : > { %660 = vrot.lane.b32.xlu1 %v657_v6, %s1817_s21  ;;  %658 = vrot.lane.b32.xlu0 %v656_v7, %s1817_s21  ;;  %668 = vst [vmem:[#allocation1] ss:$2 sm:$0xff] %v2029_v3  ;;  %s1832_s21 = smov 83  }
  0xf7   : > { %v479_v26 = vpop.permute.xlu0 %478  ;;  %v516_v30 = vpop.permute.xlu2 %515 }
  0xf8   : > { %v481_v28 = vsel %vm480_vm9, %v477_v17, %v479_v26  ;;  %v352_v17 = vld [vmem:[#allocation2] sm:$0xf]  ;;  %vm688_vm9 = vcmask 834560  }
  0xf9   : > { %483 = vst [vmem:[#allocation3 + $0x28] sm:$0xf] %v481_v28 }
  0xfa   : > { %353 = vst [vmem:[#allocation3] sm:$0xf] %v352_v17 }
  0xfc   : > { %v670_v8 = vld.sshfl [vmem:[#allocation1 + $0x8] sm:$0xff pattern:$0x75316420]  ;;  %v669_v9 = vld.sshfl [vmem:[#allocation1] sm:$0xff pattern:$0x75316420] }
  0xfd   : > { %673 = vrot.lane.b32.xlu0 %v670_v8, %s1818_s30  ;;  %681 = vst [vmem:[#allocation1] ss:$2 sm:$0xff] %v2029_v3  ;;  %671 = vrot.lane.b32.xlu2 %v669_v9, %s1818_s30  ;;  %s1833_s30 = smov 82  }
  0xff   : > { %v490_v27 = vpop.permute.xlu1 %489  ;;  %v531_v36 = vpop.permute.xlu2 %530 }
 0x100   : > { %v494_v29 = vsel %vm493_vm10, %v490_v27, %v492_v22  ;;  %vm701_vm10 = vcmask 826368  }
 0x101   : > { %496 = vst [vmem:[#allocation3 + $0x2c] sm:$0xf] %v494_v29 }
 0x104   : > { %v682_v15 = vld.sshfl [vmem:[#allocation1] sm:$0xff pattern:$0x75316420]  ;;  %v683_v16 = vld.sshfl [vmem:[#allocation1 + $0x8] sm:$0xff pattern:$0x75316420] }
 0x105   : > { %684 = vrot.lane.b32.xlu1 %v682_v15, %s1819_s22  ;;  %694 = vst [vmem:[#allocation1] ss:$2 sm:$0xff] %v2029_v3  ;;  %686 = vrot.lane.b32.xlu2 %v683_v16, %s1819_s22  ;;  %s1834_s22 = smov 81  }
 0x107   : > { %v505_v33 = vpop.permute.xlu1 %504  ;;  %v503_v34 = vpop.permute.xlu0 %502 }
 0x108   : > { %v507_v35 = vsel %vm506_vm11, %v503_v34, %v505_v33  ;;  %vm714_vm11 = vcmask 818176  }
 0x109   : > { %509 = vst [vmem:[#allocation3 + $0x30] sm:$0xf] %v507_v35 }
 0x10c   : > { %v696_v18 = vld.sshfl [vmem:[#allocation1 + $0x8] sm:$0xff pattern:$0x75316420]  ;;  %v695_v19 = vld.sshfl [vmem:[#allocation1] sm:$0xff pattern:$0x75316420] }
 0x10d   : > { %699 = vrot.lane.b32.xlu1 %v696_v18, %s1820_s12  ;;  %697 = vrot.lane.b32.xlu0 %v695_v19, %s1820_s12  ;;  %707 = vst [vmem:[#allocation1] ss:$2 sm:$0xff] %v2029_v3  ;;  %s1835_s12 = smov 80  }
 0x10f   : > { %v518_v39 = vpop.permute.xlu0 %517  ;;  %v555_v43 = vpop.permute.xlu2 %554 }
 0x110   : > { %v520_v41 = vsel %vm519_vm12, %v516_v30, %v518_v39  ;;  %vm740_vm12 = vcmask 801792  }
 0x111   : > { %522 = vst [vmem:[#allocation3 + $0x34] sm:$0xf] %v520_v41 }
 0x114   : > { %v709_v23 = vld.sshfl [vmem:[#allocation1 + $0x8] sm:$0xff pattern:$0x75316420]  ;;  %v708_v24 = vld.sshfl [vmem:[#allocation1] sm:$0xff pattern:$0x75316420] }
 0x115   : > { %712 = vrot.lane.b32.xlu0 %v709_v23, %s1821_s15  ;;  %720 = vst [vmem:[#allocation1] ss:$2 sm:$0xff] %v2029_v3  ;;  %710 = vrot.lane.b32.xlu2 %v708_v24, %s1821_s15  ;;  %s1836_s15 = smov 79  }
 0x117   : > { %v529_v40 = vpop.permute.xlu1 %528  ;;  %v570_v49 = vpop.permute.xlu2 %569 }
 0x118   : > { %v533_v42 = vsel %vm532_vm13, %v529_v40, %v531_v36  ;;  %vm727_vm13 = vcmask 809984  }
 0x119   : > { %535 = vst [vmem:[#allocation3 + $0x38] sm:$0xf] %v533_v42 }
 0x11c   : > { %v721_v31 = vld.sshfl [vmem:[#allocation1] sm:$0xff pattern:$0x75316420]  ;;  %v722_v32 = vld.sshfl [vmem:[#allocation1 + $0x8] sm:$0xff pattern:$0x75316420] }
 0x11d   : > { %723 = vrot.lane.b32.xlu1 %v721_v31, %s1822_s19  ;;  %733 = vst [vmem:[#allocation1] ss:$2 sm:$0xff] %v2029_v3  ;;  %725 = vrot.lane.b32.xlu2 %v722_v32, %s1822_s19  ;;  %s1837_s19 = smov 78  }
 0x11f   : > { %v544_v46 = vpop.permute.xlu1 %543  ;;  %v542_v47 = vpop.permute.xlu0 %541 }
 0x120   : > { %v546_v48 = vsel %vm545_vm14, %v542_v47, %v544_v46  ;;  %vm753_vm14 = vcmask 793600  }
 0x121   : > { %548 = vst [vmem:[#allocation3 + $0x3c] sm:$0xf] %v546_v48 }
 0x124   : > { %v734_v37 = vld.sshfl [vmem:[#allocation1] sm:$0xff pattern:$0x75316420]  ;;  %v735_v38 = vld.sshfl [vmem:[#allocation1 + $0x8] sm:$0xff pattern:$0x75316420] }
 0x125   : > { %746 = vst [vmem:[#allocation1] ss:$2 sm:$0xff] %v2029_v3  ;;  %736 = vrot.lane.b32.xlu2 %v734_v37, %s1823_s4 }
 0x127   : > { %v557_v52 = vpop.permute.xlu0 %556  ;;  %v594_v56 = vpop.permute.xlu2 %593 }
 0x128   : > { %v559_v54 = vsel %vm558_vm15, %v555_v43, %v557_v52  ;;  %vm844_vm15 = vcmask 736256  }
 0x129   : > { %561 = vst [vmem:[#allocation3 + $0x40] sm:$0xf] %v559_v54 }
 0x12c   : > { %v748_v44 = vld.sshfl [vmem:[#allocation1 + $0x8] sm:$0xff pattern:$0x75316420]  ;;  %v747_v45 = vld.sshfl [vmem:[#allocation1] sm:$0xff pattern:$0x75316420] }
 0x12d   : > { %751 = vrot.lane.b32.xlu1 %v748_v44, %s1824_s29  ;;  %759 = vst [vmem:[#allocation1] ss:$2 sm:$0xff] %v2029_v3  ;;  %749 = vrot.lane.b32.xlu0 %v747_v45, %s1824_s29  ;;  %s1839_s29 = smov 76  }
 0x12e   : > { %738 = vrot.lane.b32.xlu2 %v735_v38, %s1823_s4  ;;  %s1838_s4 = smov 77  }
 0x12f   : > { %v568_v53 = vpop.permute.xlu1 %567  ;;  %v609_v62 = vpop.permute.xlu2 %608 }
 0x130   : > { %v572_v55 = vsel %vm571_vm0, %v568_v53, %v570_v49  ;;  %vm857_vm0 = vcmask 728064  }
 0x131   : > { %574 = vst [vmem:[#allocation3 + $0x44] sm:$0xf] %v572_v55 }
 0x134   : > { %v2063_v50 = vld.sshfl [vmem:[#allocation1] sm:$0xff pattern:$0x75316420]  ;;  %v2065_v51 = vld.sshfl [vmem:[#allocation1 + $0x8] sm:$0xff pattern:$0x75316420] }
 0x135   : > { %772 = vst [vmem:[#allocation1] ss:$2 sm:$0xff] %v2029_v3 }
 0x137   : > { %v583_v59 = vpop.permute.xlu1 %582  ;;  %v581_v60 = vpop.permute.xlu0 %580 }
 0x138   : > { %v585_v61 = vsel %vm584_vm1, %v581_v60, %v583_v59  ;;  %vm870_vm1 = vcmask 719872  }
 0x139   : > { %587 = vst [vmem:[#allocation3 + $0x48] sm:$0xf] %v585_v61 }
 0x13c   : > { %v2068_v57 = vld.sshfl [vmem:[#allocation1] sm:$0xff pattern:$0x75316420]  ;;  %v2070_v58 = vld.sshfl [vmem:[#allocation1 + $0x8] sm:$0xff pattern:$0x75316420] }
 0x13d   : > { %785 = vst [vmem:[#allocation1] ss:$2 sm:$0xff] %v2029_v3 }
 0x13f   : > { %v596_v1 = vpop.permute.xlu0 %595  ;;  %v633_v6 = vpop.permute.xlu2 %632 }
 0x140   : > { %v598_v4 = vsel %vm597_vm2, %v594_v56, %v596_v1  ;;  %vm883_vm2 = vcmask 711680  }
 0x141   : > { %600 = vst [vmem:[#allocation3 + $0x4c] sm:$0xf] %v598_v4 }
 0x144   : > { %v2073_v63 = vld.sshfl [vmem:[#allocation1] sm:$0xff pattern:$0x75316420]  ;;  %v2075_v0 = vld.sshfl [vmem:[#allocation1 + $0x8] sm:$0xff pattern:$0x75316420] }
 0x145   : > { %798 = vst [vmem:[#allocation1] ss:$2 sm:$0xff] %v2029_v3 }
 0x147   : > { %v607_v2 = vpop.permute.xlu1 %606  ;;  %v648_v12 = vpop.permute.xlu2 %647 }
 0x148   : > { %v611_v5 = vsel %vm610_vm3, %v607_v2, %v609_v62  ;;  %vm896_vm3 = vcmask 703488  }
 0x149   : > { %613 = vst [vmem:[#allocation3 + $0x50] sm:$0xf] %v611_v5 }
 0x14c   : > { %v2078_v7 = vld.sshfl [vmem:[#allocation1] sm:$0xff pattern:$0x75316420]  ;;  %v2080_v8 = vld.sshfl [vmem:[#allocation1 + $0x8] sm:$0xff pattern:$0x75316420] }
 0x14d   : > { %811 = vst [vmem:[#allocation1] ss:$2 sm:$0xff] %v2029_v3 }
 0x14f   : > { %v622_v9 = vpop.permute.xlu1 %621  ;;  %v620_v10 = vpop.permute.xlu0 %619 }
 0x150   : > { %v624_v11 = vsel %vm623_vm4, %v620_v10, %v622_v9  ;;  %vm909_vm4 = vcmask 695296  }
 0x151   : > { %626 = vst [vmem:[#allocation3 + $0x54] sm:$0xf] %v624_v11 }
 0x154   : > { %v2083_v13 = vld.sshfl [vmem:[#allocation1] sm:$0xff pattern:$0x75316420]  ;;  %v2085_v14 = vld.sshfl [vmem:[#allocation1 + $0x8] sm:$0xff pattern:$0x75316420] }
 0x155   : > { %824 = vst [vmem:[#allocation1] ss:$2 sm:$0xff] %v2029_v3 }
 0x157   : > { %v635_v15 = vpop.permute.xlu0 %634  ;;  %v672_v18 = vpop.permute.xlu2 %671 }
 0x158   : > { %v637_v16 = vsel %vm636_vm5, %v633_v6, %v635_v15  ;;  %vm922_vm5 = vcmask 687104  }
 0x159   : > { %639 = vst [vmem:[#allocation3 + $0x58] sm:$0xf] %v637_v16 }
 0x15c   : > { %v2088_v19 = vld.sshfl [vmem:[#allocation1] sm:$0xff pattern:$0x75316420]  ;;  %v2090_v20 = vld.sshfl [vmem:[#allocation1 + $0x8] sm:$0xff pattern:$0x75316420] }
 0x15d   : > { %837 = vst [vmem:[#allocation1] ss:$2 sm:$0xff] %v2029_v3 }
 0x15f   : > { %v646_v21 = vpop.permute.xlu1 %645  ;;  %v687_v25 = vpop.permute.xlu2 %686 }
 0x160   : > { %v650_v22 = vsel %vm649_vm6, %v646_v21, %v648_v12  ;;  %v1184_v21 = vld [vmem:[#allocation3 + $0x48] sm:$0xff]  ;;  %vm935_vm6 = vcmask 678912  }
 0x161   : > { %652 = vst [vmem:[#allocation3 + $0x5c] sm:$0xf] %v650_v22  ;;  %v1183_v22 = vld [vmem:[#allocation3 + $0x40] sm:$0xff] }
 0x164   : > { %v838_v23 = vld.sshfl [vmem:[#allocation1] sm:$0xff pattern:$0x75316420]  ;;  %v839_v24 = vld.sshfl [vmem:[#allocation1 + $0x8] sm:$0xff pattern:$0x75316420] }
 0x165   : > { %840 = vrot.lane.b32.xlu0 %v838_v23, %s1825_s7  ;;  %842 = vrot.lane.b32.xlu1 %v839_v24, %s1825_s7  ;;  %850 = vst [vmem:[#allocation1] ss:$2 sm:$0xff] %v2029_v3  ;;  %s1840_s7 = smov 75  }
 0x167   : > { %v661_v26 = vpop.permute.xlu1 %660  ;;  %v659_v27 = vpop.permute.xlu0 %658 }
 0x168   : > { %v663_v28 = vsel %vm662_vm7, %v659_v27, %v661_v26  ;;  %v1186_v17 = vld [vmem:[#allocation3 + $0x58] sm:$0xff]  ;;  %v1181_v26 = vld [vmem:[#allocation3 + $0x30] sm:$0xff]  ;;  %v1180_v27 = vld [vmem:[#allocation3 + $0x28] sm:$0xff]  ;;  %vm948_vm7 = vcmask 670720  }
 0x169   : > { %665 = vst [vmem:[#allocation3 + $0x60] sm:$0xf] %v663_v28 }
 0x16c   : > { %v852_v29 = vld.sshfl [vmem:[#allocation1 + $0x8] sm:$0xff pattern:$0x75316420]  ;;  %v851_v30 = vld.sshfl [vmem:[#allocation1] sm:$0xff pattern:$0x75316420] }
 0x16d   : > { %855 = vrot.lane.b32.xlu0 %v852_v29, %s1826_s8  ;;  %863 = vst [vmem:[#allocation1] ss:$2 sm:$0xff] %v2029_v3  ;;  %853 = vrot.lane.b32.xlu2 %v851_v30, %s1826_s8  ;;  %v1179_v30 = vld [vmem:[#allocation3 + $0x20] sm:$0xff]  ;;  %s1841_s8 = smov 74  }
 0x16f   : > { %v674_v31 = vpop.permute.xlu0 %673  ;;  %v711_v32 = vpop.permute.xlu2 %710 }
 0x170   : > { %v676_v33 = vsel %vm675_vm8, %v672_v18, %v674_v31  ;;  %v1185_v18 = vld [vmem:[#allocation3 + $0x50] sm:$0xff]  ;;  %v1178_v31 = vld [vmem:[#allocation3 + $0x18] sm:$0xff]  ;;  %vm961_vm8 = vcmask 662528  }
 0x171   : > { %678 = vst [vmem:[#allocation3 + $0x64] sm:$0xf] %v676_v33  ;;  %v2105_v33 = vld [vmem:[#allocation2] sm:$0xff] }
 0x174   : > { %v864_v34 = vld.sshfl [vmem:[#allocation1] sm:$0xff pattern:$0x75316420]  ;;  %v865_v35 = vld.sshfl [vmem:[#allocation1 + $0x8] sm:$0xff pattern:$0x75316420] }
 0x175   : > { %866 = vrot.lane.b32.xlu1 %v864_v34, %s1827_s13  ;;  %876 = vst [vmem:[#allocation1] ss:$2 sm:$0xff] %v2029_v3  ;;  %868 = vrot.lane.b32.xlu2 %v865_v35, %s1827_s13  ;;  %v1176_v34 = vld [vmem:[#allocation3 + $0x8] sm:$0xff]  ;;  %s1842_s13 = smov 73  }
 0x177   : > { %v685_v36 = vpop.permute.xlu1 %684  ;;  %v726_v37 = vpop.permute.xlu2 %725 }
 0x178   : > { %v689_v38 = vsel %vm688_vm9, %v685_v36, %v687_v25  ;;  %v1187_v12 = vld [vmem:[#allocation3 + $0x60] sm:$0xff]  ;;  %v1182_v25 = vld [vmem:[#allocation3 + $0x38] sm:$0xff]  ;;  %vm974_vm9 = vcmask 654336  }
 0x179   : > { %691 = vst [vmem:[#allocation3 + $0x68] sm:$0xf] %v689_v38 }
 0x17c   : > { %v877_v39 = vld.sshfl [vmem:[#allocation1] sm:$0xff pattern:$0x75316420]  ;;  %v878_v40 = vld.sshfl [vmem:[#allocation1 + $0x8] sm:$0xff pattern:$0x75316420] }
 0x17d   : > { %879 = vrot.lane.b32.xlu0 %v877_v39, %s1828_s16  ;;  %881 = vrot.lane.b32.xlu1 %v878_v40, %s1828_s16  ;;  %889 = vst [vmem:[#allocation1] ss:$2 sm:$0xff] %v2029_v3  ;;  %s1843_s16 = smov 72  }
 0x17f   : > { %v700_v41 = vpop.permute.xlu1 %699  ;;  %v698_v42 = vpop.permute.xlu0 %697 }
 0x180   : > { %v702_v43 = vsel %vm701_vm10, %v698_v42, %v700_v41  ;;  %v737_v44 = vpop.permute.xlu2 %736  ;;  %vm987_vm10 = vcmask 646144  }
 0x181   : > { %704 = vst [vmem:[#allocation3 + $0x6c] sm:$0xf] %v702_v43 }
 0x184   : > { %v891_v45 = vld.sshfl [vmem:[#allocation1 + $0x8] sm:$0xff pattern:$0x75316420]  ;;  %v890_v46 = vld.sshfl [vmem:[#allocation1] sm:$0xff pattern:$0x75316420] }
 0x185   : > { %894 = vrot.lane.b32.xlu0 %v891_v45, %s1829_s17  ;;  %902 = vst [vmem:[#allocation1] ss:$2 sm:$0xff] %v2029_v3  ;;  %892 = vrot.lane.b32.xlu2 %v890_v46, %s1829_s17  ;;  %s1844_s17 = smov 71  }
 0x187   : > { %v713_v47 = vpop.permute.xlu0 %712 }
 0x188   : > { %v715_v48 = vsel %vm714_vm11, %v711_v32, %v713_v47  ;;  %v739_v49 = vpop.permute.xlu2 %738  ;;  %v1188_v11 = vld [vmem:[#allocation3 + $0x68] sm:$0xff]  ;;  %v1177_v32 = vld [vmem:[#allocation3 + $0x10] sm:$0xff]  ;;  %vm1000_vm11 = vcmask 637952  }
 0x189   : > { %717 = vst [vmem:[#allocation3 + $0x70] sm:$0xf] %v715_v48  ;;  %v741_v52 = vsel %vm740_vm12, %v737_v44, %v739_v49  ;;  %vm1013_vm12 = vcmask 629760  }
 0x18a   : > { %743 = vst [vmem:[#allocation3 + $0x78] sm:$0xf] %v741_v52 }
 0x18c   : > { %v904_v53 = vld.sshfl [vmem:[#allocation1 + $0x8] sm:$0xff pattern:$0x75316420]  ;;  %v903_v54 = vld.sshfl [vmem:[#allocation1] sm:$0xff pattern:$0x75316420] }
 0x18d   : > { %905 = vrot.lane.b32.xlu1 %v903_v54, %s1830_s18  ;;  %915 = vst [vmem:[#allocation1] ss:$2 sm:$0xff] %v2029_v3  ;;  %907 = vrot.lane.b32.xlu2 %v904_v53, %s1830_s18  ;;  %s1845_s18 = smov 70  }
 0x18f   : > { %v724_v55 = vpop.permute.xlu1 %723 }
 0x190   : > { %v728_v56 = vsel %vm727_vm13, %v724_v55, %v726_v37  ;;  %v1175_v37 = vld [vmem:[#allocation3] sm:$0xff]  ;;  %vm1026_vm13 = vcmask 621568  }
 0x191   : > { %730 = vst [vmem:[#allocation3 + $0x74] sm:$0xf] %v728_v56 }
 0x194   : > { %v916_v59 = vld.sshfl [vmem:[#allocation1] sm:$0xff pattern:$0x75316420]  ;;  %v917_v60 = vld.sshfl [vmem:[#allocation1 + $0x8] sm:$0xff pattern:$0x75316420] }
 0x195   : > { %918 = vrot.lane.b32.xlu0 %v916_v59, %s1831_s20  ;;  %920 = vrot.lane.b32.xlu1 %v917_v60, %s1831_s20  ;;  %928 = vst [vmem:[#allocation1] ss:$2 sm:$0xff] %v2029_v3  ;;  %s1846_s20 = smov 69  }
 0x198   : > { %v1189_v10 = vld [vmem:[#allocation3 + $0x70] sm:$0xff] }
 0x19c   : > { %v929_v61 = vld.sshfl [vmem:[#allocation1] sm:$0xff pattern:$0x75316420]  ;;  %v930_v62 = vld.sshfl [vmem:[#allocation1 + $0x8] sm:$0xff pattern:$0x75316420] }
 0x19d   : > { %933 = vrot.lane.b32.xlu0 %v930_v62, %s1832_s21  ;;  %941 = vst [vmem:[#allocation1] ss:$2 sm:$0xff] %v2029_v3  ;;  %931 = vrot.lane.b32.xlu2 %v929_v61, %s1832_s21  ;;  %s1847_s21 = smov 68  }
 0x19f   : > { %v752_v1 = vpop.permute.xlu1 %751  ;;  %v750_v2 = vpop.permute.xlu0 %749 }
 0x1a0   : > { %v754_v4 = vsel %vm753_vm14, %v750_v2, %v752_v1  ;;  %vm1039_vm14 = vcmask 613376  }
 0x1a1   : > { %756 = vst [vmem:[#allocation3 + $0x7c] sm:$0xf] %v754_v4 }
 0x1a4   : > { %v942_v5 = vld.sshfl [vmem:[#allocation1] sm:$0xff pattern:$0x75316420]  ;;  %v943_v6 = vld.sshfl [vmem:[#allocation1 + $0x8] sm:$0xff pattern:$0x75316420] }
 0x1a5   : > { %944 = vrot.lane.b32.xlu1 %v942_v5, %s1833_s30  ;;  %954 = vst [vmem:[#allocation1] ss:$2 sm:$0xff] %v2029_v3  ;;  %946 = vrot.lane.b32.xlu2 %v943_v6, %s1833_s30  ;;  %s1848_s30 = smov 67  }
 0x1a8   : > { %v1190_v9 = vld [vmem:[#allocation3 + $0x78] sm:$0xff] }
 0x1a9   : > { %1213 = vmatpush.msra.mxu0 %v1190_v9 }
 0x1ab   : > { %1214 = vmatpush.msra.mxu0 %v1189_v10 }
 0x1ac   : > { %v955_v15 = vld.sshfl [vmem:[#allocation1] sm:$0xff pattern:$0x75316420]  ;;  %v956_v16 = vld.sshfl [vmem:[#allocation1 + $0x8] sm:$0xff pattern:$0x75316420] }
 0x1ad   : > { %1215 = vmatpush.msra.mxu0 %v1188_v11  ;;  %957 = vrot.lane.b32.xlu0 %v955_v15, %s1834_s22  ;;  %967 = vst [vmem:[#allocation1] ss:$2 sm:$0xff] %v2029_v3 }
 0x1ae   : > { %959 = vrot.lane.b32.xlu1 %v956_v16, %s1834_s22  ;;  %s1849_s22 = smov 66  }
 0x1af   : > { %1216 = vmatpush.msra.mxu0 %v1187_v12 }
 0x1b1   : > { %1217 = vmatpush.msra.mxu0 %v1186_v17 }
 0x1b3   : > { %1218 = vmatpush.msra.mxu0 %v1185_v18 }
 0x1b4   : > { %v969_v23 = vld.sshfl [vmem:[#allocation1 + $0x8] sm:$0xff pattern:$0x75316420]  ;;  %v968_v24 = vld.sshfl [vmem:[#allocation1] sm:$0xff pattern:$0x75316420] }
 0x1b5   : > { %1219 = vmatpush.msra.mxu0 %v1184_v21  ;;  %972 = vrot.lane.b32.xlu0 %v969_v23, %s1835_s12  ;;  %980 = vst [vmem:[#allocation1] ss:$2 sm:$0xff] %v2029_v3 }
 0x1b6   : > { %970 = vrot.lane.b32.xlu2 %v968_v24, %s1835_s12  ;;  %s1850_s12 = smov 65  }
 0x1b7   : > { %1220 = vmatpush.msra.mxu0 %v1183_v22 }
 0x1b9   : > { %1221 = vmatpush.msra.mxu0 %v1182_v25 }
 0x1bb   : > { %1222 = vmatpush.msra.mxu0 %v1181_v26 }
 0x1bc   : > { %v981_v28 = vld.sshfl [vmem:[#allocation1] sm:$0xff pattern:$0x75316420]  ;;  %v982_v29 = vld.sshfl [vmem:[#allocation1 + $0x8] sm:$0xff pattern:$0x75316420] }
 0x1bd   : > { %1223 = vmatpush.msra.mxu0 %v1180_v27  ;;  %983 = vrot.lane.b32.xlu1 %v981_v28, %s1836_s15  ;;  %993 = vst [vmem:[#allocation1] ss:$2 sm:$0xff] %v2029_v3 }
 0x1be   : > { %985 = vrot.lane.b32.xlu2 %v982_v29, %s1836_s15  ;;  %s1851_s15 = smov 92  }
 0x1bf   : > { %1224 = vmatpush.msra.mxu0 %v1179_v30 }
 0x1c1   : > { %1225 = vmatpush.msra.mxu0 %v1178_v31 }
 0x1c3   : > { %1226 = vmatpush.msra.mxu0 %v1177_v32 }
 0x1c4   : > { %v994_v35 = vld.sshfl [vmem:[#allocation1] sm:$0xff pattern:$0x75316420]  ;;  %v995_v36 = vld.sshfl [vmem:[#allocation1 + $0x8] sm:$0xff pattern:$0x75316420] }
 0x1c5   : > { %1227 = vmatpush.msra.mxu0 %v1176_v34  ;;  %996 = vrot.lane.b32.xlu0 %v994_v35, %s1837_s19  ;;  %1006 = vst [vmem:[#allocation1] ss:$2 sm:$0xff] %v2105_v33 }
 0x1c6   : > { %998 = vrot.lane.b32.xlu1 %v995_v36, %s1837_s19  ;;  %s1852_s19 = smov 94  }
 0x1c7   : > { %1228 = vmatpush.msra.mxu0 %v1175_v37  ;;  %v854_v53 = vpop.permute.xlu2 %853 }
 0x1cc   : > { %v1008_v3 = vld.sshfl [vmem:[#allocation1 + $0x8] sm:$0xff pattern:$0x75316420]  ;;  %v1007_v38 = vld.sshfl [vmem:[#allocation1] sm:$0xff pattern:$0x75316420] }
 0x1cd   : > { %1011 = vrot.lane.b32.xlu0 %v1008_v3, %s1838_s4  ;;  %1019 = vst [vmem:[#allocation1] ss:$2 sm:$0xff] %v2105_v33  ;;  %1009 = vrot.lane.b32.xlu2 %v1007_v38, %s1838_s4  ;;  %s1853_s4 = smov 91  }
 0x1cf   : > { %v869_v61 = vpop.permute.xlu2 %868 }
 0x1d4   : > { %v1020_v39 = vld.sshfl [vmem:[#allocation1] sm:$0xff pattern:$0x75316420]  ;;  %v1021_v40 = vld.sshfl [vmem:[#allocation1 + $0x8] sm:$0xff pattern:$0x75316420] }
 0x1d5   : > { %1022 = vrot.lane.b32.xlu1 %v1020_v39, %s1839_s29  ;;  %1032 = vst [vmem:[#allocation1] ss:$2 sm:$0xff] %v2105_v33  ;;  %1024 = vrot.lane.b32.xlu2 %v1021_v40, %s1839_s29  ;;  %s1854_s29 = smov 93  }
 0x1d7   : > { %v841_v45 = vpop.permute.xlu0 %840  ;;  %v843_v48 = vpop.permute.xlu1 %842 }
 0x1d8   : > { %v845_v52 = vsel %vm844_vm15, %v841_v45, %v843_v48  ;;  %vm1052_vm15 = vcmask 605184  }
 0x1d9   : > { %847 = vst [vmem:[#allocation3 + $0x98] sm:$0xf] %v845_v52 }
 0x1dc   : > { %v1033_v41 = vld.sshfl [vmem:[#allocation1] sm:$0xff pattern:$0x75316420]  ;;  %v1034_v42 = vld.sshfl [vmem:[#allocation1 + $0x8] sm:$0xff pattern:$0x75316420] }
 0x1dd   : > { %1035 = vrot.lane.b32.xlu0 %v1033_v41, %s1840_s7  ;;  %1037 = vrot.lane.b32.xlu1 %v1034_v42, %s1840_s7  ;;  %1045 = vst [vmem:[#allocation1] ss:$2 sm:$0xff] %v2105_v33  ;;  %s1855_s7 = smov 95  }
 0x1df   : > { %v856_v49 = vpop.permute.xlu0 %855  ;;  %v893_v9 = vpop.permute.xlu2 %892 }
 0x1e0   : > { %v858_v54 = vsel %vm857_vm0, %v854_v53, %v856_v49  ;;  %vm1065_vm0 = vcmask 596992  }
 0x1e1   : > { %860 = vst [vmem:[#allocation3 + $0x9c] sm:$0xf] %v858_v54 }
 0x1e4   : > { %v1047_v43 = vld.sshfl [vmem:[#allocation1 + $0x8] sm:$0xff pattern:$0x75316420]  ;;  %v1046_v44 = vld.sshfl [vmem:[#allocation1] sm:$0xff pattern:$0x75316420] }
 0x1e5   : > { %1050 = vrot.lane.b32.xlu0 %v1047_v43, %s1841_s8  ;;  %1058 = vst [vmem:[#allocation1] ss:$2 sm:$0xff] %v2105_v33  ;;  %1048 = vrot.lane.b32.xlu2 %v1046_v44, %s1841_s8  ;;  %s1856_s8 = smov 96  }
 0x1e7   : > { %v867_v62 = vpop.permute.xlu1 %866  ;;  %v908_v17 = vpop.permute.xlu2 %907 }
 0x1e8   : > { %v871_v1 = vsel %vm870_vm1, %v867_v62, %v869_v61  ;;  %vm1078_vm1 = vcmask 588800  }
 0x1e9   : > { %873 = vst [vmem:[#allocation3 + $0xa0] sm:$0xf] %v871_v1 }
 0x1ec   : > { %v1059_v46 = vld.sshfl [vmem:[#allocation1] sm:$0xff pattern:$0x75316420]  ;;  %v1060_v47 = vld.sshfl [vmem:[#allocation1 + $0x8] sm:$0xff pattern:$0x75316420] }
 0x1ed   : > { %1061 = vrot.lane.b32.xlu1 %v1059_v46, %s1842_s13  ;;  %1071 = vst [vmem:[#allocation1] ss:$2 sm:$0xff] %v2105_v33  ;;  %1063 = vrot.lane.b32.xlu2 %v1060_v47, %s1842_s13 }
 0x1ef   : > { %v880_v2 = vpop.permute.xlu0 %879  ;;  %v882_v6 = vpop.permute.xlu1 %881 }
 0x1f0   : > { %v884_v10 = vsel %vm883_vm2, %v880_v2, %v882_v6  ;;  %vm1091_vm2 = vcmask 580608  }
 0x1f1   : > { %886 = vst [vmem:[#allocation3 + $0xa4] sm:$0xf] %v884_v10 }
 0x1f4   : > { %v1072_v55 = vld.sshfl [vmem:[#allocation1] sm:$0xff pattern:$0x75316420]  ;;  %v1073_v56 = vld.sshfl [vmem:[#allocation1 + $0x8] sm:$0xff pattern:$0x75316420] }
 0x1f5   : > { %1074 = vrot.lane.b32.xlu0 %v1072_v55, %s1843_s16  ;;  %1076 = vrot.lane.b32.xlu1 %v1073_v56, %s1843_s16  ;;  %1084 = vst [vmem:[#allocation1] ss:$2 sm:$0xff] %v2105_v33  ;;  %s1725_s16 = scalar_lea.hbm %s2183_s6, 4 }
 0x1f7   : > { %v895_v11 = vpop.permute.xlu0 %894  ;;  %v932_v26 = vpop.permute.xlu2 %931 }
 0x1f8   : > { %v897_v12 = vsel %vm896_vm3, %v893_v9, %v895_v11  ;;  %vm1104_vm3 = vcmask 572416  }
 0x1f9   : > { %899 = vst [vmem:[#allocation3 + $0xa8] sm:$0xf] %v897_v12 }
 0x1fc   : > { %v1086_v59 = vld.sshfl [vmem:[#allocation1 + $0x8] sm:$0xff pattern:$0x75316420]  ;;  %v1085_v60 = vld.sshfl [vmem:[#allocation1] sm:$0xff pattern:$0x75316420] }
 0x1fd   : > { %1089 = vrot.lane.b32.xlu0 %v1086_v59, %s1844_s17  ;;  %1097 = vst [vmem:[#allocation1] ss:$2 sm:$0xff] %v2105_v33  ;;  %1087 = vrot.lane.b32.xlu2 %v1085_v60, %s1844_s17 }
 0x1ff   : > { %v906_v18 = vpop.permute.xlu1 %905  ;;  %v947_v32 = vpop.permute.xlu2 %946 }
 0x200   : > { %v910_v21 = vsel %vm909_vm4, %v906_v18, %v908_v17  ;;  %vm1117_vm4 = vcmask 564224  }
 0x201   : > { %912 = vst [vmem:[#allocation3 + $0xac] sm:$0xf] %v910_v21 }
 0x204   : > { %v1098_v4 = vld.sshfl [vmem:[#allocation1] sm:$0xff pattern:$0x75316420]  ;;  %v1099_v5 = vld.sshfl [vmem:[#allocation1 + $0x8] sm:$0xff pattern:$0x75316420] }
 0x205   : > { %1100 = vrot.lane.b32.xlu1 %v1098_v4, %s1845_s18  ;;  %1110 = vst [vmem:[#allocation1] ss:$2 sm:$0xff] %v2105_v33  ;;  %1102 = vrot.lane.b32.xlu2 %v1099_v5, %s1845_s18 }
 0x207   : > { %v919_v22 = vpop.permute.xlu0 %918  ;;  %v921_v25 = vpop.permute.xlu1 %920 }
 0x208   : > { %v923_v27 = vsel %vm922_vm5, %v919_v22, %v921_v25  ;;  %vm1130_vm5 = vcmask 556032  }
 0x209   : > { %925 = vst [vmem:[#allocation3 + $0xb0] sm:$0xf] %v923_v27 }
 0x20c   : > { %v1112_v15 = vld.sshfl [vmem:[#allocation1 + $0x8] sm:$0xff pattern:$0x75316420]  ;;  %v1111_v16 = vld.sshfl [vmem:[#allocation1] sm:$0xff pattern:$0x75316420] }
 0x20d   : > { %1115 = vrot.lane.b32.xlu1 %v1112_v15, %s1846_s20  ;;  %1113 = vrot.lane.b32.xlu0 %v1111_v16, %s1846_s20  ;;  %1123 = vst [vmem:[#allocation1] ss:$2 sm:$0xff] %v2105_v33  ;;  %s1459_s20 = sshll.u32 %s2022_s14, 1 }
 0x20f   : > { %v934_v28 = vpop.permute.xlu0 %933 }
 0x210   : > { %v936_v29 = vsel %vm935_vm6, %v932_v26, %v934_v28  ;;  %v971_v39 = vpop.permute.xlu2 %970  ;;  %vm1143_vm6 = vcmask 547840  }
 0x211   : > { %938 = vst [vmem:[#allocation3 + $0xb4] sm:$0xf] %v936_v29  ;;  %v1173_v29 = vld [vmem:[#allocation5] sm:$0xff] }
 0x212   : > { %1229 = vmatmul.f32.vlgmr.msra.gmra.mxu0 %v1173_v29 }
 0x214   : > { %v1125_v23 = vld.sshfl [vmem:[#allocation1 + $0x8] sm:$0xff pattern:$0x75316420]  ;;  %v1124_v24 = vld.sshfl [vmem:[#allocation1] sm:$0xff pattern:$0x75316420] }
 0x215   : > { %1128 = vrot.lane.b32.xlu0 %v1125_v23, %s1847_s21  ;;  %1136 = vst [vmem:[#allocation1] ss:$2 sm:$0xff] %v2105_v33  ;;  %1126 = vrot.lane.b32.xlu2 %v1124_v24, %s1847_s21  ;;  %s1462_s21 = sshll.u32 %s1783_s26, 1  ;;  %s1312_s26 = scalar_lea.sflag [#allocation7], %s2022_s14 }
 0x217   : > { %v945_v34 = vpop.permute.xlu1 %944 }
 0x218   : > { %v949_v35 = vsel %vm948_vm7, %v945_v34, %v947_v32  ;;  %v986_v45 = vpop.permute.xlu2 %985  ;;  %vm1156_vm7 = vcmask 539648  }
 0x219   : > { %951 = vst [vmem:[#allocation3 + $0xb8] sm:$0xf] %v949_v35 }
 0x21c   : > { %v1137_v30 = vld.sshfl [vmem:[#allocation1] sm:$0xff pattern:$0x75316420]  ;;  %v1138_v31 = vld.sshfl [vmem:[#allocation1 + $0x8] sm:$0xff pattern:$0x75316420] }
 0x21d   : > { %1139 = vrot.lane.b32.xlu1 %v1137_v30, %s1848_s30  ;;  %1149 = vst [vmem:[#allocation1] ss:$2 sm:$0xff] %v2105_v33  ;;  %1141 = vrot.lane.b32.xlu2 %v1138_v31, %s1848_s30 }
 0x21f   : > { %v958_v36 = vpop.permute.xlu0 %957 }
 0x220   : > { %v960_v38 = vpop.permute.xlu1 %959 }
 0x221   : > { %v962_v40 = vsel %vm961_vm8, %v958_v36, %v960_v38  ;;  %vm1169_vm8 = vcmask 531456   ;;  %v1857_v38 = vmov 0  }
 0x222   : > { %964 = vst [vmem:[#allocation3 + $0xbc] sm:$0xf] %v962_v40  ;;  %1609 = vset.pattern.permute.xlu0 %v1857_v38  ;;  %1610 = vset.pattern.permute.xlu1 %v1857_v38 }
 0x224   : > { %v1151_v37 = vld.sshfl [vmem:[#allocation1 + $0x8] sm:$0xff pattern:$0x75316420]  ;;  %v1150_v3 = vld.sshfl [vmem:[#allocation1] sm:$0xff pattern:$0x75316420] }
 0x225   : > { %1154 = vrot.lane.b32.xlu1 %v1151_v37, %s1849_s22  ;;  %1152 = vrot.lane.b32.xlu0 %v1150_v3, %s1849_s22  ;;  %1162 = vst [vmem:[#allocation1] ss:$2 sm:$0xff] %v2105_v33  ;;  %v1207_v37 = vld [vmem:[%s2178_s1] sm:$0xff] }
 0x227   : > { %v973_v41 = vpop.permute.xlu0 %972 }
 0x228   : > { %v975_v42 = vsel %vm974_vm9, %v971_v39, %v973_v41  ;;  %vm818_vm9 = vcmask 752640  }
 0x229   : > { %977 = vst [vmem:[#allocation3 + $0xc0] sm:$0xf] %v975_v42 }
 0x22c   : > { %v1164_v43 = vld.sshfl [vmem:[#allocation1 + $0x8] sm:$0xff pattern:$0x75316420]  ;;  %v1163_v44 = vld.sshfl [vmem:[#allocation1] sm:$0xff pattern:$0x75316420] }
 0x22d   : > { %1167 = vrot.lane.b32.xlu0 %v1164_v43, %s1850_s12  ;;  %816 = vrot.lane.b32.xlu1 %v2085_v14, %s1851_s15  ;;  %v1010_v14 = vpop.permute.xlu2 %1009 }
 0x22e   : > { %1165 = vrot.lane.b32.xlu2 %v1163_v44, %s1850_s12  ;;  %s1323_s12 = scalar_lea.hbm %s2183_s6, %s1462_s21 }
 0x22f   : > { %v984_v33 = vpop.permute.xlu1 %983 }
 0x230   : > { %v988_v46 = vsel %vm987_vm10, %v984_v33, %v986_v45  ;;  %vm792_vm10 = vcmask 769024  }
 0x231   : > { %990 = vst [vmem:[#allocation3 + $0xc4] sm:$0xf] %v988_v46 }
 0x235   : > { %814 = vrot.lane.b32.xlu0 %v2083_v13, %s1851_s15  ;;  %788 = vrot.lane.b32.xlu1 %v2073_v63, %s1852_s19  ;;  %v1025_v63 = vpop.permute.xlu2 %1024  ;;  %s346_s15 = scalar_lea.vmem [#allocation11], %s1459_s20 }
 0x236   : > { %827 = vrot.lane.b32.xlu2 %v2088_v19, %s1853_s4 }
 0x237   : > { %v997_v47 = vpop.permute.xlu0 %996 }
 0x238   : > { %v999_v48 = vpop.permute.xlu1 %998 }
 0x239   : > { %v1001_v49 = vsel %vm1000_vm11, %v997_v47, %v999_v48  ;;  %vm831_vm11 = vcmask 744448   ;;  %v1199_v47 = vld [vmem:[#allocation3 + $0xc0] sm:$0xff] }
 0x23a   : > { %1003 = vst [vmem:[#allocation3 + $0xc8] sm:$0xf] %v1001_v49 }
 0x23d   : > { %829 = vrot.lane.b32.xlu0 %v2090_v20, %s1853_s4  ;;  %803 = vrot.lane.b32.xlu1 %v2080_v8, %s1854_s29  ;;  %s1327_s4 = sshll.u32 %s1323_s12, 4  ;;  %s1328_s4 = int_to_ptr.hbm [resolvable:$true] %s1327_s4 }
 0x23e   : > { %790 = vrot.lane.b32.xlu2 %v2075_v0, %s1852_s19  ;;  %s1325_s19 = sshll.u32 %s346_s15, 4  ;;  %s1326_s19 = int_to_ptr.vmem [resolvable:$true] %s1325_s19 }
 0x23f   : > { %v1012_v13 = vpop.permute.xlu0 %1011 }
 0x240   : > { %v1014_v52 = vsel %vm1013_vm12, %v1010_v14, %v1012_v13  ;;  %vm805_vm12 = vcmask 760832   ;;  %v1198_v13 = vld [vmem:[#allocation3 + $0xb8] sm:$0xff] }
 0x241   : > { %1016 = vst [vmem:[#allocation3 + $0xcc] sm:$0xf] %v1014_v52 }
 0x245   : > { %801 = vrot.lane.b32.xlu0 %v2078_v7, %s1854_s29  ;;  %775 = vrot.lane.b32.xlu1 %v2068_v57, %s1855_s7  ;;  %v1049_v7 = vpop.permute.xlu2 %1048  ;;  %s1719_s29 = sshra.s32 %s1328_s4, 4  ;;  %s1720_s29 = int_to_ptr.hbm [resolvable:$true] %s1719_s29 }
 0x246   : > { %762 = vrot.lane.b32.xlu2 %v2063_v50, %s1856_s8  ;;  %p1726_p10 = scmp.lt.s32.totalorder %s1720_s29, %s2183_s6 }
 0x247   : > { %v1023_v19 = vpop.permute.xlu1 %1022 }
 0x248   : > { %v1027_v20 = vsel %vm1026_vm13, %v1023_v19, %v1025_v63  ;;  %v1200_v33 = vld [vmem:[#allocation3 + $0xc8] sm:$0xff]  ;;  %vm779_vm13 = vcmask 777216   ;;  %v1197_v63 = vld [vmem:[#allocation3 + $0xb0] sm:$0xff] }
 0x249   : > { %1029 = vst [vmem:[#allocation3 + $0xd0] sm:$0xf] %v1027_v20  ;;  %v1196_v19 = vld [vmem:[#allocation3 + $0xa8] sm:$0xff]  ;;  %v1195_v20 = vld [vmem:[#allocation3 + $0xa0] sm:$0xff] }
 0x24d   : > { %764 = vrot.lane.b32.xlu0 %v2065_v51, %s1856_s8  ;;  %v1064_v55 = vpop.permute.xlu2 %1063 }
 0x24e   : > { %777 = vrot.lane.b32.xlu2 %v2070_v58, %s1855_s7  ;;  %s1721_s7 = scalar_lea.hbm %s1720_s29, 2 }
 0x24f   : > { %v1036_v0 = vpop.permute.xlu0 %1035  ;;  %v1038_v8 = vpop.permute.xlu1 %1037  ;;  %p1722_p7 = scmp.ne.s32.totalorder %s1720_s29, %s1721_s7  ;;  %p1727_p11 = scmp.lt.s32.totalorder %s1725_s16, %s1721_s7 }
 0x250   : > { %v1040_v53 = vsel %vm1039_vm14, %v1036_v0, %v1038_v8  ;;  %vm766_vm14 = vcmask 785408  }
 0x251   : > { %1042 = vst [vmem:[#allocation3 + $0xd4] sm:$0xf] %v1040_v53  ;;  %v1194_v53 = vld [vmem:[#allocation3 + $0x98] sm:$0xff]  ;;  %p1723_p8 = pnand %p1722_p7, %p1990_p0  ;;  %p1728_p12 = por %p1727_p11, %p1726_p10 }
 0x253   : > { %p1724_p9 = pneg %p1723_p8 }
 0x255   : > { %1210 = vperm.xlu0 %1609, %v1207_v37   ;;  %p1729_p13 = pnand %p1728_p12, %p1724_p9 }
 0x257   : > { %v1051_v57 = vpop.permute.xlu0 %1050  ;;  %v1088_v59 = vpop.permute.xlu2 %1087 }
 0x258   : > { %v1053_v54 = vsel %vm1052_vm15, %v1049_v7, %v1051_v57  ;;  %v1201_v45 = vld [vmem:[#allocation3 + $0xd0] sm:$0xff]  ;;  %vm1262_vm15 = vcmask 64512  }
 0x259   : > { %1055 = vst [vmem:[#allocation3 + $0xd8] sm:$0xf] %v1053_v54  ;;  %v1174_v54 = vld [vmem:[#allocation5 + $0x8] sm:$0xff] }
 0x25f   : > { %v1062_v50 = vpop.permute.xlu1 %1061  ;;  %v1103_v1 = vpop.permute.xlu2 %1102 }
 0x260   : > { %v1066_v56 = vsel %vm1065_vm0, %v1062_v50, %v1064_v55  ;;  %v1255_v50 = vld [vmem:[#allocation4] sm:$0x1] }
 0x261   : > { %1068 = vst [vmem:[#allocation3 + $0xdc] sm:$0xf] %v1066_v56  ;;  %1258 = vperm.xlu1 %1610, %v1255_v50  }
 0x267   : > { %v1075_v51 = vpop.permute.xlu0 %1074  ;;  %v1077_v60 = vpop.permute.xlu1 %1076 }
 0x268   : > { %v1079_v61 = vsel %vm1078_vm1, %v1075_v51, %v1077_v60  ;;  %v1202_v44 = vld [vmem:[#allocation3 + $0xd8] sm:$0xff] }
 0x269   : > { %1081 = vst [vmem:[#allocation3 + $0xe0] sm:$0xf] %v1079_v61 }
 0x26f   : > { %v1090_v58 = vpop.permute.xlu0 %1089  ;;  %v1127_v5 = vpop.permute.xlu2 %1126 }
 0x270   : > { %v1092_v62 = vsel %vm1091_vm2, %v1088_v59, %v1090_v58 }
 0x271   : > { %1094 = vst [vmem:[#allocation3 + $0xe4] sm:$0xf] %v1092_v62  ;;  %v1254_v62 = vld [vmem:[%s2179_s2] sm:$0x1] }
 0x277   : > { %v1101_v2 = vpop.permute.xlu1 %1100  ;;  %v1142_v11 = vpop.permute.xlu2 %1141 }
 0x278   : > { %v1105_v4 = vsel %vm1104_vm3, %v1101_v2, %v1103_v1  ;;  %v1203_v40 = vld [vmem:[#allocation3 + $0xe0] sm:$0xff] }
 0x279   : > { %1107 = vst [vmem:[#allocation3 + $0xe8] sm:$0xf] %v1105_v4 }
 0x27f   : > { %v1116_v6 = vpop.permute.xlu1 %1115  ;;  %v1114_v9 = vpop.permute.xlu0 %1113 }
 0x280   : > { %v1118_v10 = vsel %vm1117_vm4, %v1114_v9, %v1116_v6  ;;  %vm1308_vm4 = vcmask 1040384  }
 0x281   : > { %1120 = vst [vmem:[#allocation3 + $0xec] sm:$0xf] %v1118_v10 }
 0x287   : > { %v1129_v12 = vpop.permute.xlu0 %1128 }
 0x288   : > { %v1131_v15 = vsel %vm1130_vm5, %v1127_v5, %v1129_v12  ;;  %v1166_v16 = vpop.permute.xlu2 %1165  ;;  %v1204_v39 = vld [vmem:[#allocation3 + $0xe8] sm:$0xff] }
 0x289   : > { %1133 = vst [vmem:[#allocation3 + $0xf0] sm:$0xf] %v1131_v15 }
 0x28f   : > { %v1140_v17 = vpop.permute.xlu1 %1139  ;;  %v1230_v59 = vpop.f32.mrf.mxu0 }
 0x290   : > { %v1144_v18 = vsel %vm1143_vm6, %v1140_v17, %v1142_v11  ;;  %v828_v21 = vpop.permute.xlu2 %827 }
 0x291   : > { %1146 = vst [vmem:[#allocation3 + $0xf4] sm:$0xf] %v1144_v18 }
 0x297   : > { %v1155_v22 = vpop.permute.xlu1 %1154  ;;  %v1153_v23 = vpop.permute.xlu0 %1152 }
 0x298   : > { %v1157_v24 = vsel %vm1156_vm7, %v1153_v23, %v1155_v22  ;;  %v791_v28 = vpop.permute.xlu2 %790  ;;  %v1205_v36 = vld [vmem:[#allocation3 + $0xf0] sm:$0xff] }
 0x299   : > { %1159 = vst [vmem:[#allocation3 + $0xf8] sm:$0xf] %v1157_v24 }
 0x29f   : > { %v1168_v25 = vpop.permute.xlu0 %1167  ;;  %v817_v26 = vpop.permute.xlu1 %816 }
 0x2a0   : > { %v1170_v27 = vsel %vm1169_vm8, %v1166_v16, %v1168_v25  ;;  %v763_v3 = vpop.permute.xlu2 %762 }
 0x2a1   : > { %1172 = vst [vmem:[#allocation3 + $0xfc] sm:$0xf] %v1170_v27 }
 0x2a7   : > { %v815_v30 = vpop.permute.xlu0 %814  ;;  %v789_v31 = vpop.permute.xlu1 %788 }
 0x2a8   : > { %v819_v32 = vsel %vm818_vm9, %v815_v30, %v817_v26  ;;  %v1206_v34 = vld [vmem:[#allocation3 + $0xf8] sm:$0xff]  ;;  %v793_v35 = vsel %vm792_vm10, %v789_v31, %v791_v28  ;;  %v778_v46 = vpop.permute.xlu2 %777 }
 0x2a9   : > { %821 = vst [vmem:[#allocation3 + $0x90] sm:$0xf] %v819_v32  ;;  %1233 = vmatpush.msra.mxu1 %v1206_v34 }
 0x2aa   : > { %795 = vst [vmem:[#allocation3 + $0x88] sm:$0xf] %v793_v35 }
 0x2ab   : > { %1234 = vmatpush.msra.mxu1 %v1205_v36 }
 0x2ad   : > { %1235 = vmatpush.msra.mxu1 %v1204_v39 }
 0x2af   : > { %v830_v41 = vpop.permute.xlu0 %829  ;;  %1236 = vmatpush.msra.mxu1 %v1203_v40  ;;  %v804_v42 = vpop.permute.xlu1 %803 }
 0x2b0   : > { %v832_v43 = vsel %vm831_vm11, %v828_v21, %v830_v41 }
 0x2b1   : > { %834 = vst [vmem:[#allocation3 + $0x94] sm:$0xf] %v832_v43  ;;  %1237 = vmatpush.msra.mxu1 %v1202_v44 }
 0x2b3   : > { %1238 = vmatpush.msra.mxu1 %v1201_v45 }
 0x2b5   : > { %1239 = vmatpush.msra.mxu1 %v1200_v33 }
 0x2b7   : > { %v802_v48 = vpop.permute.xlu0 %801  ;;  %1240 = vmatpush.msra.mxu1 %v1199_v47  ;;  %v776_v49 = vpop.permute.xlu1 %775 }
 0x2b8   : > { %v806_v14 = vsel %vm805_vm12, %v802_v48, %v804_v42  ;;  %v780_v52 = vsel %vm779_vm13, %v776_v49, %v778_v46  ;;  %v1193_v7 = vld [vmem:[#allocation3 + $0x90] sm:$0xff] }
 0x2b9   : > { %808 = vst [vmem:[#allocation3 + $0x8c] sm:$0xf] %v806_v14  ;;  %1241 = vmatpush.msra.mxu1 %v1198_v13 }
 0x2ba   : > { %782 = vst [vmem:[#allocation3 + $0x84] sm:$0xf] %v780_v52 }
 0x2bb   : > { %1242 = vmatpush.msra.mxu1 %v1197_v63 }
 0x2bd   : > { %1243 = vmatpush.msra.mxu1 %v1196_v19 }
 0x2bf   : > { %v765_v0 = vpop.permute.xlu0 %764  ;;  %1244 = vmatpush.msra.mxu1 %v1195_v20 }
 0x2c0   : > { %v767_v8 = vsel %vm766_vm14, %v763_v3, %v765_v0  ;;  %v1192_v57 = vld [vmem:[#allocation3 + $0x88] sm:$0xff] }
 0x2c1   : > { %769 = vst [vmem:[#allocation3 + $0x80] sm:$0xf] %v767_v8  ;;  %1245 = vmatpush.msra.mxu1 %v1194_v53 }
 0x2c3   : > { %1246 = vmatpush.msra.mxu1 %v1193_v7 }
 0x2c5   : > { %1247 = vmatpush.msra.mxu1 %v1192_v57 }
 0x2c7   : > { %v1211_v56 = vpop.permute.xlu0 %1210 }
 0x2c8   : > { %v1191_v55 = vld [vmem:[#allocation3 + $0x80] sm:$0xff]  ;;  %v1231_v51 = vadd.f32 %v1230_v59, %v1211_v56 }
 0x2c9   : > { %1248 = vmatpush.msra.mxu1 %v1191_v55 }
 0x2ca   : > { %1249 = vmatmul.f32.vlgmr.msra.gmra.mxu1 %v1174_v54 }
 0x2d3   : > { %v1259_v1 = vpop.permute.xlu1 %1258 }
 0x2d4   : > { %v1261_v2 = vperm.slane %v1259_v1, 0 }
 0x347   : > { %v1250_v60 = vpop.f32.mrf.mxu1 }
 0x348   : > { %v1251_v61 = vadd.f32 %v1250_v60, %v1231_v51 }
 0x34a   : > { %v1253_v58 = vmax.f32 %v1251_v61, 0.0 }
 0x34c   : > { %1281 = vmatpush.msra.mxu2 %v1253_v58 }
 0x34d   : > { %1460 = vmatmul.msk.f32.vlgmr.msra.gmra.mxu2 %vm1262_vm15, %v1254_v62 }
 0x3d0   : > { %v1283_v4 = vpop.f32.mrf.mxu2 }
 0x3d1   : > { %v1284_v5 = vadd.f32 %v1283_v4, %v1261_v2 }
 0x3d3   : > { %v1286_v6 = vsub.f32 0.0, %v1284_v5 }
 0x3d5   : > { %v1287_v9 = vmul.f32 1.442695, %v1286_v6 }
 0x3d7   : > { %1611 = vpow2.f32 %v1287_v9 }
 0x3dd   : > { %v1612_v10 = vpop.eup %1611 }
 0x3de   : > { %v1289_v11 = vadd.f32 1.0, %v1612_v10 }
 0x3e0   : > { %1613 = vrcp.f32 %v1289_v11  ;;  %v1301_v17 = vand.u32 2147483648, %v1289_v11  ;;  %v1299_v21 = vand.u32 2147483647, %v1289_v11  ;;  %vm1295_vm1 = vweird.f32 %v1289_v11 }
 0x3e2   : > { %v1302_v23 = vor.u32 1.1754944e-38, %v1301_v17  ;;  %vm1300_vm3 = vcmp.eq.f32.partialorder %v1299_v21, 8.507059e+37 }
 0x3e6   : > { %v1614_v12 = vpop.eup %1613 }
 0x3e7   : > { %v1291_v15 = vmul.f32 %v1614_v12, %v1289_v11  ;;  %vm1296_vm0 = vweird.f32 %v1614_v12 }
 0x3e8   : > { %vm1297_vm2 = vmor %vm1295_vm1, %vm1296_vm0 }
 0x3e9   : > { %v1292_v16 = vsub.f32 1.0, %v1291_v15 }
 0x3eb   : > { %v1293_v18 = vmul.f32 %v1614_v12, %v1292_v16 }
 0x3ed   : > { %v1294_v22 = vadd.f32 %v1614_v12, %v1293_v18 }
 0x3ef   : > { %v1298_v24 = vsel %vm1297_vm2, %v1614_v12, %v1294_v22 }
 0x3f0   : > { %v1303_v25 = vsel %vm1300_vm3, %v1302_v23, %v1298_v24 }
 0x3f1   : > { %v1304_v26 = vsub.f32 1.0, %v1303_v25  ;;  %v1306_v27 = vrot.slane %v1303_v25, 7 }
 0x3f3   : > { %v1309_v28 = vsel %vm1308_vm4, %v1304_v26, %v1306_v27 }
 0x3f4   : > { %1310 = vst [vmem:[%s346_s15] sm:$0x3] %v1309_v28 }
 0x3f5   : > { %1732 = shalt.err (!%p1729_p13)
}
 0x3f6   : > { %1475 = dma.vmem_to_hbm [thread:$0]  (%p1990_p0), %s1326_s19, 32, %s1328_s4, %s1312_s26  }
 0x3f7 PF: > { %s1339_s14 = sand.u32 1, %s1771_s23   ;;  %p1489_p4 = pnand %p1448_p3, %p1994_p2 }
 0x3f8   : > { %s1340_s20 = scalar_lea.sflag [#allocation7], %s1339_s14 }
 0x3f9   : > { %p1490_p5 = pneg %p1489_p4 }
 0x3fb   : > { %1766 = dma.done.wait (%p1490_p5), %s1340_s20, 32  }
 0x3fc   : > { %1768 = vsyncadd (%p1490_p5), %s1340_s20, 4294967264  ;;  %s25_s28 = sadd.s32 1, %s1791_s28   ;;  %s2192_s23 = smov %s1775_s24 }
 0x3fd   : > { %p22_p1 = scmp.ge.s32.totalorder %s25_s28, 4   ;;  %s2193_s24 = smov %s1779_s25 }
 0x3fe   : > { %s2194_s25 = smov %s1948_s11  ;;  %s2195_s26 = smov %s1787_s27 }
 0x3ff   : > { %s2196_s27 = smov %s2198_s3  ;;  %24 = sbr.rel (!%p22_p1) target bundleno = 10 (0xa), region = 105 }
 0x404   :  { %1346 = vsyncpa [#allocation6], 1 }
 0x405   :  { %1348 = vsyncpa [#allocation6 + $0x1], 1 }
 0x406   :  { %1349 = vsyncpa [#allocation9], 1 }
 0x407   :  { %1351 = vsyncpa [#allocation9 + $0x1], 1 }
 0x408   :  { %1352 = vsyncpa [#allocation7], 1 }
 0x409   :  { %1354 = vsyncpa [#allocation7 + $0x1], 1 }

</bundles_post_ra>
